<compile_context>
chip_gen: v5e
topology: v5e:2x2
jax: 0.10.0
libtpu: 0.0.40
codegen_flags: <defaults>
</compile_context>

<pallas_src>
import jax
import jax.numpy as jnp
import numpy as np
from jax.experimental import pallas as pl
from jax.experimental.pallas import tpu as pltpu


def _deconv_sigmoid_kernel(w_ref, b_ref, x_ref, o_ref):
    # w_ref: (C_out*4, C_in) bf16   b_ref: (C_out*4, 1) f32
    # x_ref: (C_in, THW)     bf16   o_ref: (C_out*4, THW) f32
    acc = jnp.dot(w_ref[...], x_ref[...], preferred_element_type=jnp.float32)
    acc = acc + b_ref[...]                      # lane-broadcast bias add (f32)
    # sigmoid = 1 / (1 + exp(-acc)): exp + approx reciprocal both go to the EUP slot.
    o_ref[...] = pl.reciprocal(1.0 + jnp.exp(-acc), approx=True).astype(o_ref.dtype)


def _pick_tile(total, candidates=(512, 256, 128)):
    for c in candidates:
        if total % c == 0:
            return c
    return total  # full-extent block is always legal


def conv_transpose2d_sigmoid(x_nchw, weight, bias):
    """x_nchw: (N, C_in, H, W) f32; weight: (C_in, C_out, 2, 2) f32; bias: (C_out,) f32.
    Returns sigmoid(conv_transpose2d(x)) of shape (N, C_out, 2H, 2W), f32."""
    N, C_in, H, W = x_nchw.shape
    _, C_out, KH, KW = weight.shape
    assert (KH, KW) == (2, 2)

    HW = H * W
    rows = C_out * KH * KW
    thw = _pick_tile(HW)

    # Kernel operands -------------------------------------------------------
    # NCHW is already (N, C_in, H*W)-contiguous: cast + free reshape, no transpose pass.
    x3d = x_nchw.astype(jnp.bfloat16).reshape(N, C_in, HW)
    # Weight: (C_in, C_out, 2, 2) -> (C_out*4, C_in), row = co*4 + kh*2 + kw (one-time, small).
    w2d = jnp.transpose(weight, (1, 2, 3, 0)).reshape(rows, C_in).astype(jnp.bfloat16)
    # Bias broadcast over the 4 kernel taps, as a column (added across lanes), kept f32.
    b2d = jnp.repeat(bias.astype(jnp.float32), KH * KW).reshape(rows, 1)

    out_packed = pl.pallas_call(
        _deconv_sigmoid_kernel,
        out_shape=jax.ShapeDtypeStruct((N, rows, HW), jnp.float32),
        grid_spec=pltpu.PrefetchScalarGridSpec(
            num_scalar_prefetch=0,
            grid=(N, HW // thw),
            in_specs=[
                # Constant-index blocks: DMA'd once, stay resident across the grid.
                pl.BlockSpec((rows, C_in), lambda n, j: (0, 0)),
                pl.BlockSpec((rows, 1), lambda n, j: (0, 0)),
                pl.BlockSpec((None, C_in, thw), lambda n, j: (n, 0, j)),
            ],
            out_specs=pl.BlockSpec((None, rows, thw), lambda n, j: (n, 0, j)),
        ),
        compiler_params=pltpu.CompilerParams(
            dimension_semantics=("parallel", "parallel"),
            vmem_limit_bytes=48 * 1024 * 1024,
        ),
    )(w2d, b2d, x3d)

    # Scatter packed rows back to NCHW:
    # (N, C_out*4, H*W) -> (N, C_out, 2, 2, H, W) -> (N, C_out, H, 2, W, 2) -> (N, C_out, 2H, 2W)
    out = out_packed.reshape(N, C_out, KH, KW, H, W)
    out = jnp.transpose(out, (0, 1, 4, 2, 5, 3)).reshape(N, C_out, H * KH, W * KW)
    return out


def _reference(x_nchw, weight, bias):
    # Pure-JAX f32 reference of ConvTranspose2d(k=2, s=2, p=0) + sigmoid.
    y = jnp.einsum("nihw,iokl->nohkwl", x_nchw, weight)
    y = y + bias[None, :, None, None, None, None]
    N, C_out, H, KH, W, KW = y.shape
    return jax.nn.sigmoid(y.reshape(N, C_out, H * KH, W * KW))


if __name__ == "__main__":
    # Small shapes consistent with the module (original: N=1, C_in=1024, C_out=512, 64x64).
    N, C_in, C_out, H, W = 2, 256, 128, 16, 16

    key = jax.random.PRNGKey(0)
    kx, kw, kb = jax.random.split(key, 3)

    x = jax.random.normal(kx, (N, C_in, H, W), dtype=jnp.float32)

    # PyTorch-style init: U(-s, s) with s = 1/sqrt(C_in * kH * kW)
    fan_in = C_in * 2 * 2
    s = 1.0 / np.sqrt(fan_in)
    weight = jax.random.uniform(kw, (C_in, C_out, 2, 2), jnp.float32, minval=-s, maxval=s)
    bias = jax.random.uniform(kb, (C_out,), jnp.float32, minval=-s, maxval=s)

    out = jax.block_until_ready(conv_transpose2d_sigmoid(x, weight, bias))
    ref = jax.block_until_ready(_reference(x, weight, bias))

    assert out.shape == (N, C_out, 2 * H, 2 * W)
    # bf16 matmul inputs (f32 accumulation) + approx reciprocal -> loosened tolerance.
    np.testing.assert_allclose(np.asarray(out), np.asarray(ref), rtol=2e-2, atol=2e-2)

    print("KERNEL_OK")
</pallas_src>

<mosaic_0001>
module attributes {stable_mosaic.version = 11 : i64} {
  func.func @_deconv_sigmoid_kernel(%arg0: i32, %arg1: i32, %arg2: memref<512x256xbf16, #tpu.memory_space<vmem>>, %arg3: memref<512x1xf32, #tpu.memory_space<vmem>>, %arg4: memref<1x256x256xbf16, #tpu.memory_space<vmem>>, %arg5: memref<1x512x256xf32, #tpu.memory_space<vmem>>) attributes {dimension_semantics = [#tpu.dimension_semantics<parallel>, #tpu.dimension_semantics<parallel>], iteration_bounds = array<i64: 2, 1>, scalar_prefetch = 0 : i64, scratch_operands = 0 : i64, tpu.core_type = #tpu.core_type<tc>, window_params = [{pipeline_mode = #tpu.pipeline_mode<synchronous>, transform_indices = @transform_0, window_bounds = array<i64: 512, 256>}, {pipeline_mode = #tpu.pipeline_mode<synchronous>, transform_indices = @transform_1, window_bounds = array<i64: 512, 1>}, {transform_indices = @transform_2, window_bounds = array<i64: 1, 256, 256>}, {transform_indices = @transform_3, window_bounds = array<i64: 1, 512, 256>}]} {
    %c0 = arith.constant 0 : index
    %c0_0 = arith.constant 0 : index
    %0 = vector.load %arg2[%c0, %c0_0] : memref<512x256xbf16, #tpu.memory_space<vmem>>, vector<512x256xbf16>
    %c0_1 = arith.constant 0 : index
    %c0_2 = arith.constant 0 : index
    %c0_3 = arith.constant 0 : index
    %1 = vector.load %arg4[%c0_1, %c0_2, %c0_3] : memref<1x256x256xbf16, #tpu.memory_space<vmem>>, vector<1x256x256xbf16>
    %2 = vector.shape_cast %1 : vector<1x256x256xbf16> to vector<256x256xbf16>
    %cst = arith.constant dense<0.000000e+00> : vector<512x256xf32>
    %3 = tpu.matmul %0, %2, %cst {dimension_numbers = #tpu.dot_dimension_numbers<[1], [0], [0], [1], [0, 0, 1, 1], [], []>} : vector<512x256xbf16>, vector<256x256xbf16>, vector<512x256xf32> -> vector<512x256xf32>
    %c0_4 = arith.constant 0 : index
    %c0_5 = arith.constant 0 : index
    %4 = vector.load %arg3[%c0_4, %c0_5] : memref<512x1xf32, #tpu.memory_space<vmem>>, vector<512x1xf32>
    %5 = vector.broadcast %4 : vector<512x1xf32> to vector<512x256xf32>
    %6 = arith.addf %3, %5 : vector<512x256xf32>
    %cst_6 = arith.constant 0.000000e+00 : f32
    %7 = vector.broadcast %cst_6 : f32 to vector<512x256xf32>
    %8 = arith.subf %7, %6 : vector<512x256xf32>
    %9 = math.exp %8 : vector<512x256xf32>
    %cst_7 = arith.constant 1.000000e+00 : f32
    %10 = vector.broadcast %cst_7 : f32 to vector<512x256xf32>
    %11 = arith.addf %10, %9 : vector<512x256xf32>
    %12 = tpu.reciprocal %11 {approx = true} : vector<512x256xf32> -> vector<512x256xf32>
    %c0_8 = arith.constant 0 : index
    %c0_9 = arith.constant 0 : index
    %c0_10 = arith.constant 0 : index
    %13 = vector.load %arg5[%c0_8, %c0_9, %c0_10] : memref<1x512x256xf32, #tpu.memory_space<vmem>>, vector<1x512x256xf32>
    %14 = vector.shape_cast %13 : vector<1x512x256xf32> to vector<512x256xf32>
    %15 = vector.shape_cast %12 : vector<512x256xf32> to vector<1x512x256xf32>
    tpu.vector_store %arg5[%c0_8, %c0_9, %c0_10], %15 {strides = array<i32>} : memref<1x512x256xf32, #tpu.memory_space<vmem>>, vector<1x512x256xf32>,
    return
  }
  func.func @transform_0(%arg0: i32, %arg1: i32) -> (i32, i32) {
    %c0_i32 = arith.constant 0 : i32
    %c0_i32_0 = arith.constant 0 : i32
    %c0_i32_1 = arith.constant 0 : i32
    return %c0_i32, %c0_i32_0 : i32, i32
  }
  func.func @transform_1(%arg0: i32, %arg1: i32) -> (i32, i32) {
    %c0_i32 = arith.constant 0 : i32
    %c0_i32_0 = arith.constant 0 : i32
    %c0_i32_1 = arith.constant 0 : i32
    return %c0_i32, %c0_i32_0 : i32, i32
  }
  func.func @transform_2(%arg0: i32, %arg1: i32) -> (i32, i32, i32) {
    %c0_i32 = arith.constant 0 : i32
    %c0_i32_0 = arith.constant 0 : i32
    return %arg0, %c0_i32, %arg1 : i32, i32, i32
  }
  func.func @transform_3(%arg0: i32, %arg1: i32) -> (i32, i32, i32) {
    %c0_i32 = arith.constant 0 : i32
    %c0_i32_0 = arith.constant 0 : i32
    return %arg0, %c0_i32, %arg1 : i32, i32, i32
  }
}

</mosaic_0001>

<bundles_post_ra>
// kernel: tpu_custom_call.1
= control target key start
LH: loop header
LB: loop body
LE: loop exit
PB: predicated region body
PF: predicated region fallthrough
CT: control target
= control target key end

     0   :  { %8 = vsyncpa [#allocation3], 0  ;;  %s4832_s0 = inlined_call_operand.vmem [shape: bf16[512,256], index: 0, kind: input, shape index: {}]   ;;  %s4833_s1 = inlined_call_operand.vmem [shape: f32[512,1], index: 1, kind: input, shape index: {}]   ;;  %s4834_s2 = inlined_call_operand.hbm [shape: bf16[2,256,256], index: 2, kind: input, shape index: {}]   ;;  %s4835_s3 = inlined_call_operand.hbm [shape: f32[2,512,256], index: 3, kind: output, shape index: {}]  }
   0x1   :  { %10 = vsyncpa [#allocation3 + $0x1], 0 }
   0x2   :  { %11 = vsyncpa [#allocation4], 0 }
   0x3   :  { %13 = vsyncpa [#allocation4 + $0x1], 0  ;;  %s3938_s12 = smov 0   ;;  %s3940_s13 = smov 0  }
   0x4   :  { %s3942_s14 = smov 0   ;;  %s3944_s15 = smov 0  }
   0x5   :  { %s3946_s16 = smov 0   ;;  %s3948_s17 = smov 0  }
   0x6 LB: > { %s2720_s18 = sadd.s32 4294967295, %s3911_s17   ;;  %s2721_s19 = sadd.s32 4294967294, %s3911_s17   ;;  %s3911_s17 = sphi %s3948_s17, %s19_s17   ;;  %s3907_s16 = sphi %s3946_s16, %s4844_s16   ;;  %s3903_s15 = sphi %s3944_s15, %s4843_s15   ;;  %s3899_s14 = sphi %s3942_s14, %s4842_s14   ;;  %s3895_s13 = sphi %s3940_s13, %s4841_s13   ;;  %s3891_s12 = sphi %s3938_s12, %s4840_s12  }
   0x7   : > { %s31_s20 = sadd.s32 1, %s3907_s16  ;;  %s82_s21 = sadd.s32 1, %s3899_s14 }
   0x8   : > { %p33_p0 = scmp.ge.s32.totalorder %s31_s20, 2  ;;  %p89_p1 = scmp.ne.s32.totalorder %s3899_s14, %s3895_s13 }
   0x9   : > { %p90_p2 = scmp.eq.s32.totalorder %s3911_s17, 0  ;;  %p95_p3 = scmp.ne.s32.totalorder %s3895_s13, %s3891_s12 }
   0xa   : > { %s4846_s20 = smov (%p33_p0, %s31_s20), 0  ;;  %p96_p5 = scmp.eq.s32.totalorder %s2720_s18, 0 }
   0xb   : > { %p3979_p4 = por %p90_p2, %p89_p1  ;;  %s77_s23 = ssub.s32 %s3907_s16, %s4846_s20 }
   0xc   : > { %p121_p6 = scmp.eq.s32.totalorder %s2720_s18, 1  ;;  %p80_p7 = scmp.eq.s32.totalorder %s77_s23, 0 }
   0xd   : > { %p3985_p8 = por %p96_p5, %p95_p3  ;;  %p127_p10 = scmp.eq.s32.totalorder %s2721_s19, 1 }
   0xe   : > { %p3989_p9 = por %p121_p6, %p89_p1  ;;  %p2723_p12 = scmp.ge.s32.totalorder %s3911_s17, 2 }
   0xf   : > { %s3994_s26 = scalar_select %p80_p7, %s3899_s14, %s82_s21  }
  0x10   : > { %p3996_p11 = por %p127_p10, %p95_p3  ;;  %p3229_p13 = scmp.lt.s32.totalorder %s3911_s17, 2 }
  0x11   : > { %s153_s28 = sand.u32 1, %s3899_s14   ;;  %s3119_s30 = sshll.u32 %s3907_s16, 8 }
  0x12   : > { %s2724_s29 = sshll.u32 %s153_s28, 8  ;;  %s164_s6 = scalar_lea.hbm %s4834_s2, %s3119_s30 }
  0x13   : > { %s157_s7 = scalar_lea.vmem [#allocation2], %s2724_s29  ;;  %s165_s9 = sshll.u32 %s164_s6, 4  ;;  %s166_s9 = int_to_ptr.hbm [resolvable:$true] %s165_s9 }
  0x14   : > { %s167_s8 = sshll.u32 %s157_s7, 4  ;;  %p3222_p0 = pnand %p3229_p13, %p3979_p4  ;;  %s168_s8 = int_to_ptr.vmem [resolvable:$true] %s167_s8 }
  0x15   : > { %p2727_p1 = scmp.ge.s32.totalorder %s3911_s17, 1  ;;  %s154_s10 = scalar_lea.sflag [#allocation3], %s153_s28 }
  0x16   : > { %s3913_s11 = smov 128   ;;  %s3914_s18 = smov 8  }
  0x17   : > { %3224 = dma.hbm_to_vmem [thread:$0]  (!%p3222_p0), %s166_s9, 4096, %s168_s8, %s154_s10, %s3913_s11, %s3913_s11, %s3914_s18  }
  0x18   : > { %p175_p2 = scmp.lt.s32.totalorder %s3911_s17, 3 }
  0x1a   : > { %p176_p3 = pnand %p2727_p1, %p175_p2 }
  0x1b   : > { %s4012_s19 = sand.u32 (!%p176_p3), 1, %s3895_s13  }
  0x1c   : > { %179 = sbr.rel (%p176_p3) target bundleno = 734 (0x2de), region = 32  ;;  %s2728_s21 = sshll.u32 (!%p176_p3), %s4012_s19, 8 }
  0x1d   : > { %s182_s23 = scalar_lea.sflag (!%p176_p3), [#allocation3], %s4012_s19  ;;  %s4016_s29 = scalar_lea.vmem (!%p176_p3), [#allocation2], %s2728_s21 }
  0x21   : > { %3882 = dma.done.wait (%p3985_p8), %s182_s23, 4096  }
  0x22   : > { %3884 = vsyncadd (%p3985_p8), %s182_s23, 4294963200  ;;  %v3044_v0 = vld [vmem:[%s4016_s29 + $0x70] sm:$0xf]  ;;  %v3199_v1 = vld [vmem:[%s4016_s29 + $0x74] sm:$0xf0]  ;;  %s2729_s8 = sshll.u32 %s4012_s19, 10 }
  0x23   : > { %v3108_v2 = vld [vmem:[%s4016_s29 + $0xf0] sm:$0xf]  ;;  %v3045_v3 = vor.u32 %v3199_v1, %v3044_v0  ;;  %v3215_v4 = vld [vmem:[%s4016_s29 + $0xf4] sm:$0xf0]  ;;  %v3198_v5 = vld [vmem:[%s4016_s29 + $0x74] sm:$0xf] }
  0x24   : > { %v3046_v6 = vld [vmem:[%s4016_s29 + $0x78] sm:$0xf0]  ;;  %v3109_v7 = vor.u32 %v3215_v4, %v3108_v2  ;;  %v3214_v9 = vld [vmem:[%s4016_s29 + $0xf4] sm:$0xf]  ;;  %v3036_v11 = vld [vmem:[%s4016_s29 + $0x60] sm:$0xf] }
  0x25   : > { %v3049_v8 = vor.u32 %v3198_v5, %v3046_v6  ;;  %v3110_v10 = vld [vmem:[%s4016_s29 + $0xf8] sm:$0xf0]  ;;  %1171 = vmatpush.bf16.msra.mxu0 %v3045_v3  ;;  %v3197_v13 = vld [vmem:[%s4016_s29 + $0x64] sm:$0xf0]  ;;  %v3100_v14 = vld [vmem:[%s4016_s29 + $0xe0] sm:$0xf] }
  0x26   : > { %v3113_v12 = vor.u32 %v3214_v9, %v3110_v10  ;;  %v3213_v15 = vld [vmem:[%s4016_s29 + $0xe4] sm:$0xf0]  ;;  %1340 = vmatpush.bf16.msra.mxu1 %v3109_v7  ;;  %v3037_v16 = vor.u32 %v3197_v13, %v3036_v11  ;;  %v3196_v18 = vld [vmem:[%s4016_s29 + $0x64] sm:$0xf]  ;;  %v3038_v19 = vld [vmem:[%s4016_s29 + $0x68] sm:$0xf0] }
  0x27   : > { %1509 = vmatpush.bf16.msra.mxu2 %v3049_v8  ;;  %v3101_v17 = vor.u32 %v3213_v15, %v3100_v14  ;;  %v3212_v20 = vld [vmem:[%s4016_s29 + $0xe4] sm:$0xf]  ;;  %v3041_v21 = vor.u32 %v3196_v18, %v3038_v19  ;;  %v3102_v22 = vld [vmem:[%s4016_s29 + $0xe8] sm:$0xf0]  ;;  %v3028_v23 = vld [vmem:[%s4016_s29 + $0x50] sm:$0xf] }
  0x28   : > { %1678 = vmatpush.bf16.msra.mxu3 %v3113_v12  ;;  %v3195_v24 = vld [vmem:[%s4016_s29 + $0x54] sm:$0xf0]  ;;  %v3105_v25 = vor.u32 %v3212_v20, %v3102_v22  ;;  %v3092_v26 = vld [vmem:[%s4016_s29 + $0xd0] sm:$0xf]  ;;  %v3194_v28 = vld [vmem:[%s4016_s29 + $0x54] sm:$0xf] }
  0x29   : > { %v3211_v27 = vld [vmem:[%s4016_s29 + $0xd4] sm:$0xf0]  ;;  %1172 = vmatpush.bf16.msra.mxu0 %v3037_v16  ;;  %v3029_v29 = vor.u32 %v3195_v24, %v3028_v23  ;;  %v3030_v30 = vld [vmem:[%s4016_s29 + $0x58] sm:$0xf0]  ;;  %v3210_v31 = vld [vmem:[%s4016_s29 + $0xd4] sm:$0xf] }
  0x2a   : > { %v3094_v32 = vld [vmem:[%s4016_s29 + $0xd8] sm:$0xf0]  ;;  %1341 = vmatpush.bf16.msra.mxu1 %v3101_v17  ;;  %v3093_v33 = vor.u32 %v3211_v27, %v3092_v26  ;;  %v3033_v34 = vor.u32 %v3194_v28, %v3030_v30  ;;  %v3020_v35 = vld [vmem:[%s4016_s29 + $0x40] sm:$0xf]  ;;  %v3193_v36 = vld [vmem:[%s4016_s29 + $0x44] sm:$0xf0] }
  0x2b   : > { %1510 = vmatpush.bf16.msra.mxu2 %v3041_v21  ;;  %v3084_v37 = vld [vmem:[%s4016_s29 + $0xc0] sm:$0xf]  ;;  %v3097_v38 = vor.u32 %v3210_v31, %v3094_v32  ;;  %v3209_v39 = vld [vmem:[%s4016_s29 + $0xc4] sm:$0xf0]  ;;  %v3192_v40 = vld [vmem:[%s4016_s29 + $0x44] sm:$0xf]  ;;  %v3021_v44 = vor.u32 %v3193_v36, %v3020_v35 }
  0x2c   : > { %1679 = vmatpush.bf16.msra.mxu3 %v3105_v25  ;;  %v3022_v41 = vld [vmem:[%s4016_s29 + $0x48] sm:$0xf0]  ;;  %v3208_v42 = vld [vmem:[%s4016_s29 + $0xc4] sm:$0xf]  ;;  %v3085_v45 = vor.u32 %v3209_v39, %v3084_v37  ;;  %v3012_v47 = vld [vmem:[%s4016_s29 + $0x30] sm:$0xf] }
  0x2d   : > { %v3086_v43 = vld [vmem:[%s4016_s29 + $0xc8] sm:$0xf0]  ;;  %1173 = vmatpush.bf16.msra.mxu0 %v3029_v29  ;;  %v3025_v46 = vor.u32 %v3192_v40, %v3022_v41  ;;  %v3191_v48 = vld [vmem:[%s4016_s29 + $0x34] sm:$0xf0]  ;;  %v3076_v49 = vld [vmem:[%s4016_s29 + $0xb0] sm:$0xf] }
  0x2e   : > { %1342 = vmatpush.bf16.msra.mxu1 %v3093_v33  ;;  %v3089_v50 = vor.u32 %v3208_v42, %v3086_v43  ;;  %v3207_v51 = vld [vmem:[%s4016_s29 + $0xb4] sm:$0xf0]  ;;  %v3190_v52 = vld [vmem:[%s4016_s29 + $0x34] sm:$0xf]  ;;  %v3014_v53 = vld [vmem:[%s4016_s29 + $0x38] sm:$0xf0]  ;;  %v3013_v56 = vor.u32 %v3191_v48, %v3012_v47 }
  0x2f   : > { %1511 = vmatpush.bf16.msra.mxu2 %v3033_v34  ;;  %v3206_v54 = vld [vmem:[%s4016_s29 + $0xb4] sm:$0xf]  ;;  %v3078_v55 = vld [vmem:[%s4016_s29 + $0xb8] sm:$0xf0]  ;;  %v3077_v57 = vor.u32 %v3207_v51, %v3076_v49  ;;  %v3017_v58 = vor.u32 %v3190_v52, %v3014_v53  ;;  %v3004_v59 = vld [vmem:[%s4016_s29 + $0x20] sm:$0xf] }
  0x30   : > { %1680 = vmatpush.bf16.msra.mxu3 %v3097_v38  ;;  %v3189_v60 = vld [vmem:[%s4016_s29 + $0x24] sm:$0xf0]  ;;  %v3068_v61 = vld [vmem:[%s4016_s29 + $0xa0] sm:$0xf]  ;;  %v3081_v62 = vor.u32 %v3206_v54, %v3078_v55  ;;  %v3188_v0 = vld [vmem:[%s4016_s29 + $0x24] sm:$0xf] }
  0x31   : > { %1174 = vmatpush.bf16.msra.mxu0 %v3021_v44  ;;  %v3205_v63 = vld [vmem:[%s4016_s29 + $0xa4] sm:$0xf0]  ;;  %v3006_v1 = vld [vmem:[%s4016_s29 + $0x28] sm:$0xf0]  ;;  %v3204_v2 = vld [vmem:[%s4016_s29 + $0xa4] sm:$0xf]  ;;  %v3005_v4 = vor.u32 %v3189_v60, %v3004_v59 }
  0x32   : > { %1343 = vmatpush.bf16.msra.mxu1 %v3085_v45  ;;  %v3070_v3 = vld [vmem:[%s4016_s29 + $0xa8] sm:$0xf0]  ;;  %v3069_v5 = vor.u32 %v3205_v63, %v3068_v61  ;;  %v3009_v6 = vor.u32 %v3188_v0, %v3006_v1  ;;  %v2996_v7 = vld [vmem:[%s4016_s29 + $0x10] sm:$0xf]  ;;  %v3187_v8 = vld [vmem:[%s4016_s29 + $0x14] sm:$0xf0] }
  0x33   : > { %1512 = vmatpush.bf16.msra.mxu2 %v3025_v46  ;;  %v3060_v9 = vld [vmem:[%s4016_s29 + $0x90] sm:$0xf]  ;;  %v3073_v10 = vor.u32 %v3204_v2, %v3070_v3  ;;  %v3203_v11 = vld [vmem:[%s4016_s29 + $0x94] sm:$0xf0]  ;;  %v3186_v12 = vld [vmem:[%s4016_s29 + $0x14] sm:$0xf]  ;;  %v2997_v17 = vor.u32 %v3187_v8, %v2996_v7 }
  0x34   : > { %1681 = vmatpush.bf16.msra.mxu3 %v3089_v50  ;;  %v2998_v13 = vld [vmem:[%s4016_s29 + $0x18] sm:$0xf0]  ;;  %v3202_v14 = vld [vmem:[%s4016_s29 + $0x94] sm:$0xf]  ;;  %v307_v16 = vld [vmem:[%s4833_s1] sm:$0xff]  ;;  %v3915_v19 = vmov 0   ;;  %v3061_v20 = vor.u32 %v3203_v11, %v3060_v9 }
  0x35   : > { %1175 = vmatpush.bf16.msra.mxu0 %v3013_v56  ;;  %v3062_v15 = vld [vmem:[%s4016_s29 + $0x98] sm:$0xf0]  ;;  %v2988_v18 = vld [vmem:[%s4016_s29] sm:$0xf]  ;;  %3284 = vset.pattern.permute.xlu0 %v3915_v19  ;;  %v3001_v21 = vor.u32 %v3186_v12, %v2998_v13  ;;  %v3185_v22 = vld [vmem:[%s4016_s29 + $0x4] sm:$0xf0] }
  0x36   : > { %1344 = vmatpush.bf16.msra.mxu1 %v3077_v57  ;;  %v3052_v23 = vld [vmem:[%s4016_s29 + $0x80] sm:$0xf]  ;;  %v309_v24 = vld [vmem:[%s4833_s1 + $0x10] sm:$0xff]  ;;  %v3065_v25 = vor.u32 %v3202_v14, %v3062_v15  ;;  %v3201_v26 = vld [vmem:[%s4016_s29 + $0x84] sm:$0xf0]  ;;  %373 = vperm.xlu0 %3284, %v307_v16   ;;  %v2989_v31 = vor.u32 %v3185_v22, %v2988_v18  ;;  %s4270_s11 = scalar_lea.vmem [#allocation5], %s2729_s8 }
  0x37   : > { %1513 = vmatpush.bf16.msra.mxu2 %v3017_v58  ;;  %v3184_v27 = vld [vmem:[%s4016_s29 + $0x4] sm:$0xf]  ;;  %v2990_v28 = vld [vmem:[%s4016_s29 + $0x8] sm:$0xf0]  ;;  %3285 = vset.pattern.permute.xlu1 %v3915_v19  ;;  %v2732_v32 = vld [vmem:[%s4832_s0] sm:$0xf]  ;;  %v3053_v34 = vor.u32 %v3201_v26, %v3052_v23 }
  0x38   : > { %1682 = vmatpush.bf16.msra.mxu3 %v3081_v62  ;;  %v3200_v29 = vld [vmem:[%s4016_s29 + $0x84] sm:$0xf]  ;;  %v3054_v30 = vld [vmem:[%s4016_s29 + $0x88] sm:$0xf0]  ;;  %3286 = vset.pattern.permute.xlu2 %v3915_v19  ;;  %v3121_v33 = vld [vmem:[%s4832_s0 + $0x4] sm:$0xf0]  ;;  %v2993_v35 = vor.u32 %v3184_v27, %v2990_v28 }
  0x39   : > { %1176 = vmatpush.bf16.msra.mxu0 %v3005_v4  ;;  %383 = vperm.xlu1 %3285, %v309_v24   ;;  %v3120_v36 = vld [vmem:[%s4832_s0 + $0x4] sm:$0xf]  ;;  %v2734_v37 = vld [vmem:[%s4832_s0 + $0x8] sm:$0xf0]  ;;  %v3057_v38 = vor.u32 %v3200_v29, %v3054_v30  ;;  %v2733_v39 = vor.u32 %v3121_v33, %v2732_v32  ;;  %v310_v42 = vld [vmem:[%s4833_s1 + $0x18] sm:$0xff]  ;;  %s3216_s30 = sshll.u32 %s3903_s15, 10 }
  0x3a   : > { %1345 = vmatpush.bf16.msra.mxu1 %v3069_v5  ;;  %v308_v40 = vld [vmem:[%s4833_s1 + $0x8] sm:$0xff]  ;;  %v2737_v41 = vor.u32 %v3120_v36, %v2734_v37  ;;  %v2740_v43 = vld [vmem:[%s4832_s0 + $0x10] sm:$0xf]  ;;  %v3123_v44 = vld [vmem:[%s4832_s0 + $0x14] sm:$0xf0]  ;;  %s2629_s6 = scalar_lea.hbm %s4835_s3, %s3216_s30  ;;  %s2630_s7 = sshll.u32 %s4270_s11, 4  ;;  %s2631_s7 = int_to_ptr.vmem [resolvable:$true] %s2630_s7 }
  0x3b   : > { %1514 = vmatpush.bf16.msra.mxu2 %v3009_v6  ;;  %v3122_v45 = vld [vmem:[%s4832_s0 + $0x14] sm:$0xf]  ;;  %v2742_v46 = vld [vmem:[%s4832_s0 + $0x18] sm:$0xf0]  ;;  %v2741_v47 = vor.u32 %v3123_v44, %v2740_v43  ;;  %v2748_v49 = vld [vmem:[%s4832_s0 + $0x20] sm:$0xf] }
  0x3c   : > { %1683 = vmatpush.bf16.msra.mxu3 %v3073_v10  ;;  %v2745_v48 = vor.u32 %v3122_v45, %v2742_v46  ;;  %v3125_v50 = vld [vmem:[%s4832_s0 + $0x24] sm:$0xf0]  ;;  %v3124_v51 = vld [vmem:[%s4832_s0 + $0x24] sm:$0xf]  ;;  %v2750_v52 = vld [vmem:[%s4832_s0 + $0x28] sm:$0xf0] }
  0x3d   : > { %1177 = vmatpush.bf16.msra.mxu0 %v2997_v17  ;;  %v2749_v53 = vor.u32 %v3125_v50, %v2748_v49  ;;  %v2753_v54 = vor.u32 %v3124_v51, %v2750_v52  ;;  %v313_v55 = vld [vmem:[%s4833_s1 + $0x30] sm:$0xff]  ;;  %v311_v56 = vld [vmem:[%s4833_s1 + $0x20] sm:$0xff]  ;;  %v314_v57 = vld [vmem:[%s4833_s1 + $0x38] sm:$0xff]  ;;  %s2632_s8 = sshll.u32 %s2629_s6, 4  ;;  %s2616_s9 = scalar_lea.sflag [#allocation4], %s4012_s19  ;;  %s2633_s8 = int_to_ptr.hbm [resolvable:$true] %s2632_s8 }
  0x3e   : > { %1346 = vmatpush.bf16.msra.mxu1 %v3061_v20  ;;  %378 = vperm.xlu0 %3284, %v308_v40   ;;  %v312_v58 = vld [vmem:[%s4833_s1 + $0x28] sm:$0xff]  ;;  %v2756_v59 = vld [vmem:[%s4832_s0 + $0x30] sm:$0xf]  ;;  %v3127_v60 = vld [vmem:[%s4832_s0 + $0x34] sm:$0xf0]  ;;  %s3843_s15 = sshra.s32 %s2633_s8, 4  ;;  %s3844_s15 = int_to_ptr.hbm [resolvable:$true] %s3843_s15 }
  0x3f   : > { %1515 = vmatpush.bf16.msra.mxu2 %v3001_v21  ;;  %393 = vperm.xlu2 %3286, %v311_v56   ;;  %v3126_v61 = vld [vmem:[%s4832_s0 + $0x34] sm:$0xf]  ;;  %v2758_v62 = vld [vmem:[%s4832_s0 + $0x38] sm:$0xf0]  ;;  %v2757_v63 = vor.u32 %v3127_v60, %v2756_v59  ;;  %v316_v1 = vld [vmem:[%s4833_s1 + $0x48] sm:$0xff]  ;;  %s3845_s10 = scalar_lea.hbm %s3844_s15, 1024  ;;  %p3850_p7 = scmp.lt.s32.totalorder %s3844_s15, %s4835_s3 }
  0x40   : > { %1684 = vmatpush.bf16.msra.mxu3 %v3065_v25  ;;  %v2761_v0 = vor.u32 %v3126_v61, %v2758_v62  ;;  %v2764_v2 = vld [vmem:[%s4832_s0 + $0x40] sm:$0xf]  ;;  %v3129_v3 = vld [vmem:[%s4832_s0 + $0x44] sm:$0xf0]  ;;  %v3128_v4 = vld [vmem:[%s4832_s0 + $0x44] sm:$0xf]  ;;  %p3846_p4 = scmp.ne.s32.totalorder %s3844_s15, %s3845_s10 }
  0x41   : > { %1178 = vmatpush.bf16.msra.mxu0 %v2989_v31  ;;  %388 = vperm.xlu1 %3285, %v310_v42   ;;  %v2766_v5 = vld [vmem:[%s4832_s0 + $0x48] sm:$0xf0]  ;;  %v2765_v6 = vor.u32 %v3129_v3, %v2764_v2  ;;  %v317_v8 = vld [vmem:[%s4833_s1 + $0x50] sm:$0xff]  ;;  %v315_v9 = vld [vmem:[%s4833_s1 + $0x40] sm:$0xff]  ;;  %s3849_s23 = scalar_lea.hbm %s4835_s3, 2048 }
  0x42   : > { %1347 = vmatpush.bf16.msra.mxu1 %v3053_v34  ;;  %v2769_v7 = vor.u32 %v3128_v4, %v2766_v5  ;;  %v2772_v10 = vld [vmem:[%s4832_s0 + $0x50] sm:$0xf]  ;;  %v3131_v11 = vld [vmem:[%s4832_s0 + $0x54] sm:$0xf0]  ;;  %v3130_v12 = vld [vmem:[%s4832_s0 + $0x54] sm:$0xf]  ;;  %p3847_p5 = pnand %p3846_p4, %p3989_p9  ;;  %p3851_p8 = scmp.lt.s32.totalorder %s3849_s23, %s3845_s10 }
  0x43   : > { %1516 = vmatpush.bf16.msra.mxu2 %v2993_v35  ;;  %v2774_v13 = vld [vmem:[%s4832_s0 + $0x58] sm:$0xf0]  ;;  %v2773_v14 = vor.u32 %v3131_v11, %v2772_v10  ;;  %v319_v16 = vld [vmem:[%s4833_s1 + $0x60] sm:$0xff]  ;;  %v320_v17 = vld [vmem:[%s4833_s1 + $0x68] sm:$0xff] }
  0x44   : > { %1685 = vmatpush.bf16.msra.mxu3 %v3057_v38  ;;  %1179 = vmatmul.bf16.vlgmr.msra.gmra.mxu0 %v2733_v39  ;;  %v2777_v15 = vor.u32 %v3130_v12, %v2774_v13  ;;  %v318_v18 = vld [vmem:[%s4833_s1 + $0x58] sm:$0xff]  ;;  %v2780_v19 = vld [vmem:[%s4832_s0 + $0x60] sm:$0xf]  ;;  %v3133_v20 = vld [vmem:[%s4832_s0 + $0x64] sm:$0xf0]  ;;  %p3848_p6 = pneg %p3847_p5  ;;  %p3852_p10 = por %p3851_p8, %p3850_p7 }
  0x45   : > { %1348 = vmatmul.bf16.vlgmr.msra.gmra.mxu1 %v2737_v41  ;;  %v3132_v21 = vld [vmem:[%s4832_s0 + $0x64] sm:$0xf]  ;;  %v2782_v22 = vld [vmem:[%s4832_s0 + $0x68] sm:$0xf0]  ;;  %v2781_v23 = vor.u32 %v3133_v20, %v2780_v19  ;;  %v322_v25 = vld [vmem:[%s4833_s1 + $0x78] sm:$0xff] }
  0x46   : > { %1517 = vmatmul.bf16.vlgmr.msra.gmra.mxu2 %v2733_v39  ;;  %403 = vperm.xlu0 %3284, %v313_v55   ;;  %v2785_v24 = vor.u32 %v3132_v21, %v2782_v22  ;;  %v2788_v26 = vld [vmem:[%s4832_s0 + $0x70] sm:$0xf]  ;;  %v3135_v27 = vld [vmem:[%s4832_s0 + $0x74] sm:$0xf0]  ;;  %v3134_v28 = vld [vmem:[%s4832_s0 + $0x74] sm:$0xf]  ;;  %p3853_p13 = pnand %p3852_p10, %p3848_p6 }
  0x47   : > { %1686 = vmatmul.bf16.vlgmr.msra.gmra.mxu3 %v2737_v41  ;;  %398 = vperm.xlu2 %3286, %v312_v58   ;;  %v2790_v29 = vld [vmem:[%s4832_s0 + $0x78] sm:$0xf0]  ;;  %v2789_v30 = vor.u32 %v3135_v27, %v2788_v26  ;;  %v323_v32 = vld [vmem:[%s4833_s1 + $0x80] sm:$0xff]  ;;  %v3137_v35 = vld [vmem:[%s4832_s0 + $0x84] sm:$0xf0] }
  0x48   : > { %v2793_v31 = vor.u32 %v3134_v28, %v2790_v29  ;;  %v2796_v34 = vld [vmem:[%s4832_s0 + $0x80] sm:$0xf]  ;;  %v3136_v36 = vld [vmem:[%s4832_s0 + $0x84] sm:$0xf]  ;;  %v2798_v37 = vld [vmem:[%s4832_s0 + $0x88] sm:$0xf0] }
  0x49   : > { %408 = vperm.xlu1 %3285, %v314_v57   ;;  %v321_v38 = vld [vmem:[%s4833_s1 + $0x70] sm:$0xff]  ;;  %v2797_v39 = vor.u32 %v3137_v35, %v2796_v34  ;;  %v2801_v41 = vor.u32 %v3136_v36, %v2798_v37  ;;  %v326_v50 = vld [vmem:[%s4833_s1 + $0x98] sm:$0xff]  ;;  %v2812_v37 = vld [vmem:[%s4832_s0 + $0xa0] sm:$0xf] }
  0x4a   : > { %v325_v46 = vld [vmem:[%s4833_s1 + $0x90] sm:$0xff]  ;;  %v3139_v61 = vld [vmem:[%s4832_s0 + $0x94] sm:$0xf0] }
  0x4b   : > { %v2804_v60 = vld [vmem:[%s4832_s0 + $0x90] sm:$0xf] }
  0x4c   : > { %v2805_v5 = vor.u32 %v3139_v61, %v2804_v60 }
  0x4e   : > { %418 = vperm.xlu0 %3284, %v316_v1  }
  0x4f   : > { %413 = vperm.xlu2 %3286, %v315_v9  }
  0x51   : > { %423 = vperm.xlu1 %3285, %v317_v8  }
  0x54   : > { %1184 = vmatmul.bf16.gmra.mxu0 %v2741_v47 }
  0x55   : > { %1353 = vmatmul.bf16.gmra.mxu1 %v2745_v48 }
  0x56   : > { %1522 = vmatmul.bf16.gmra.mxu2 %v2741_v47  ;;  %433 = vperm.xlu0 %3284, %v319_v16  }
  0x57   : > { %1691 = vmatmul.bf16.gmra.mxu3 %v2745_v48  ;;  %428 = vperm.xlu2 %3286, %v318_v18  }
  0x59   : > { %438 = vperm.xlu1 %3285, %v320_v17  }
  0x5e   : > { %448 = vperm.xlu0 %3284, %v322_v25   ;;  %v328_v25 = vld [vmem:[%s4833_s1 + $0xa8] sm:$0xff] }
  0x5f   : > { %443 = vperm.xlu2 %3286, %v321_v38   ;;  %v3141_v38 = vld [vmem:[%s4832_s0 + $0xa4] sm:$0xf0] }
  0x61   : > { %453 = vperm.xlu1 %3285, %v323_v32  }
  0x64   : > { %1189 = vmatmul.bf16.gmra.mxu0 %v2749_v53 }
  0x65   : > { %1358 = vmatmul.bf16.gmra.mxu1 %v2753_v54 }
  0x66   : > { %1527 = vmatmul.bf16.gmra.mxu2 %v2749_v53  ;;  %463 = vperm.xlu0 %3284, %v325_v46  }
  0x67   : > { %1696 = vmatmul.bf16.gmra.mxu3 %v2753_v54 }
  0x69   : > { %468 = vperm.xlu1 %3285, %v326_v50  }
  0x6e   : > { %478 = vperm.xlu0 %3284, %v328_v25  }
  0x74   : > { %1194 = vmatmul.bf16.gmra.mxu0 %v2757_v63 }
  0x75   : > { %1363 = vmatmul.bf16.gmra.mxu1 %v2761_v0 }
  0x76   : > { %1532 = vmatmul.bf16.gmra.mxu2 %v2757_v63  ;;  %v3138_v63 = vld [vmem:[%s4832_s0 + $0x94] sm:$0xf] }
  0x77   : > { %1701 = vmatmul.bf16.gmra.mxu3 %v2761_v0  ;;  %v2806_v0 = vld [vmem:[%s4832_s0 + $0x98] sm:$0xf0] }
  0x78   : > { %v2809_v11 = vor.u32 %v3138_v63, %v2806_v0 }
  0x84   : > { %1199 = vmatmul.bf16.gmra.mxu0 %v2765_v6 }
  0x85   : > { %1368 = vmatmul.bf16.gmra.mxu1 %v2769_v7 }
  0x86   : > { %1537 = vmatmul.bf16.gmra.mxu2 %v2765_v6  ;;  %v324_v6 = vld [vmem:[%s4833_s1 + $0x88] sm:$0xff] }
  0x87   : > { %1706 = vmatmul.bf16.gmra.mxu3 %v2769_v7  ;;  %458 = vperm.xlu2 %3286, %v324_v6  }
  0x94   : > { %1204 = vmatmul.bf16.gmra.mxu0 %v2773_v14 }
  0x95   : > { %1373 = vmatmul.bf16.gmra.mxu1 %v2777_v15 }
  0x96   : > { %1542 = vmatmul.bf16.gmra.mxu2 %v2773_v14 }
  0x97   : > { %1711 = vmatmul.bf16.gmra.mxu3 %v2777_v15 }
  0x99   : > { %v394_v36 = vpop.permute.xlu2 %393 }
  0xa4   : > { %1209 = vmatmul.bf16.gmra.mxu0 %v2781_v23 }
  0xa5   : > { %1378 = vmatmul.bf16.gmra.mxu1 %v2785_v24 }
  0xa6   : > { %1547 = vmatmul.bf16.gmra.mxu2 %v2781_v23 }
  0xa7   : > { %1716 = vmatmul.bf16.gmra.mxu3 %v2785_v24 }
  0xa8   : > { %v374_v33 = vpop.permute.xlu0 %373 }
  0xab   : > { %v384_v59 = vpop.permute.xlu1 %383 }
  0xb0   : > { %v379_v47 = vpop.permute.xlu0 %378 }
  0xb3   : > { %v389_v20 = vpop.permute.xlu1 %388 }
  0xb4   : > { %1214 = vmatmul.bf16.gmra.mxu0 %v2789_v30 }
  0xb5   : > { %1383 = vmatmul.bf16.gmra.mxu1 %v2793_v31 }
  0xb6   : > { %1552 = vmatmul.bf16.gmra.mxu2 %v2789_v30 }
  0xb7   : > { %1721 = vmatmul.bf16.gmra.mxu3 %v2793_v31 }
  0xb8   : > { %v404_v25 = vpop.permute.xlu0 %403 }
  0xc1   : > { %v1180_v40 = vpop.f32.mrf.mxu0 }
  0xc2   : > { %v1181_v42 = vadd.f32 %v1180_v40, %v374_v33  ;;  %v1349_v43 = vpop.f32.mrf.mxu1  ;;  %v3140_v40 = vld [vmem:[%s4832_s0 + $0xa4] sm:$0xf] }
  0xc4   : > { %v1350_v44 = vadd.f32 %v1349_v43, %v1181_v42  ;;  %1219 = vmatmul.bf16.gmra.mxu0 %v2797_v39 }
  0xc5   : > { %1388 = vmatmul.bf16.gmra.mxu1 %v2801_v41 }
  0xc6   : > { %1557 = vmatmul.bf16.gmra.mxu2 %v2797_v39  ;;  %v1847_v45 = vsub.f32 0.0, %v1350_v44 }
  0xc7   : > { %1726 = vmatmul.bf16.gmra.mxu3 %v2801_v41  ;;  %v2814_v41 = vld [vmem:[%s4832_s0 + $0xa8] sm:$0xf0] }
  0xc8   : > { %v1975_v48 = vmul.f32 1.442695, %v1847_v45 }
  0xc9   : > { %v1518_v49 = vpop.f32.mrf.mxu2  ;;  %v1182_v53 = vpop.f32.mrf.mxu0 }
  0xca   : > { %v1519_v51 = vadd.f32 %v1518_v49, %v374_v33  ;;  %v1687_v52 = vpop.f32.mrf.mxu3  ;;  %3287 = vpow2.f32 %v1975_v48  ;;  %v1183_v54 = vadd.f32 %v1182_v53, %v379_v47  ;;  %v1351_v55 = vpop.f32.mrf.mxu1  ;;  %v2813_v48 = vor.u32 %v3141_v38, %v2812_v37 }
  0xcb   : > { %v2817_v53 = vor.u32 %v3140_v40, %v2814_v41 }
  0xcc   : > { %v1688_v56 = vadd.f32 %v1687_v52, %v1519_v51  ;;  %v1352_v57 = vadd.f32 %v1351_v55, %v1183_v54 }
  0xce   : > { %v1848_v58 = vsub.f32 0.0, %v1688_v56  ;;  %v1849_v62 = vsub.f32 0.0, %v1352_v57 }
  0xd0   : > { %v1977_v1 = vmul.f32 1.442695, %v1848_v58  ;;  %v3288_v2 = vpop.eup %3287  ;;  %v1979_v3 = vmul.f32 1.442695, %v1849_v62  ;;  %v329_v62 = vld [vmem:[%s4833_s1 + $0xb0] sm:$0xff] }
  0xd1   : > { %v1520_v4 = vpop.f32.mrf.mxu2  ;;  %v2231_v7 = vadd.f32 1.0, %v3288_v2  ;;  %v1185_v10 = vpop.f32.mrf.mxu0  ;;  %483 = vperm.xlu1 %3285, %v329_v62  }
  0xd2   : > { %3289 = vpow2.f32 %v1977_v1  ;;  %v1521_v8 = vadd.f32 %v1520_v4, %v379_v47  ;;  %v1689_v9 = vpop.f32.mrf.mxu3  ;;  %v1186_v12 = vadd.f32 %v1185_v10, %v384_v59  ;;  %v1354_v13 = vpop.f32.mrf.mxu1 }
  0xd3   : > { %3291 = vpow2.f32 %v1979_v3  ;;  %v399_v1 = vpop.permute.xlu2 %398 }
  0xd4   : > { %3293 = vrcp.f32 %v2231_v7  ;;  %v1690_v14 = vadd.f32 %v1689_v9, %v1521_v8  ;;  %v1355_v15 = vadd.f32 %v1354_v13, %v1186_v12  ;;  %1224 = vmatmul.bf16.gmra.mxu0 %v2805_v5 }
  0xd5   : > { %1393 = vmatmul.bf16.gmra.mxu1 %v2809_v11 }
  0xd6   : > { %v1850_v16 = vsub.f32 0.0, %v1690_v14  ;;  %1562 = vmatmul.bf16.gmra.mxu2 %v2805_v5  ;;  %v1851_v17 = vsub.f32 0.0, %v1355_v15 }
  0xd7   : > { %1731 = vmatmul.bf16.gmra.mxu3 %v2809_v11 }
  0xd8   : > { %v3290_v18 = vpop.eup %3289  ;;  %v1981_v19 = vmul.f32 1.442695, %v1850_v16  ;;  %v1983_v23 = vmul.f32 1.442695, %v1851_v17  ;;  %v2820_v17 = vld [vmem:[%s4832_s0 + $0xb0] sm:$0xf] }
  0xd9   : > { %v3292_v21 = vpop.eup %3291  ;;  %v2232_v22 = vadd.f32 1.0, %v3290_v18  ;;  %v1523_v24 = vpop.f32.mrf.mxu2  ;;  %v3143_v18 = vld [vmem:[%s4832_s0 + $0xb4] sm:$0xf0] }
  0xda   : > { %v3294_v26 = vpop.eup %3293  ;;  %v2233_v27 = vadd.f32 1.0, %v3292_v21  ;;  %3295 = vpow2.f32 %v1981_v19  ;;  %v1524_v28 = vadd.f32 %v1523_v24, %v384_v59  ;;  %v1692_v29 = vpop.f32.mrf.mxu3  ;;  %v2822_v21 = vld [vmem:[%s4832_s0 + $0xb8] sm:$0xf0] }
  0xdb   : > { %v1187_v30 = vpop.f32.mrf.mxu0  ;;  %2487 = vst [vmem:[%s4270_s11] sm:$0xff] %v3294_v26  ;;  %3297 = vrcp.f32 %v2232_v22  ;;  %v1356_v32 = vpop.f32.mrf.mxu1  ;;  %v327_v22 = vld [vmem:[%s4833_s1 + $0xa0] sm:$0xff] }
  0xdc   : > { %v1188_v31 = vadd.f32 %v1187_v30, %v389_v20  ;;  %3299 = vrcp.f32 %v2233_v27  ;;  %v1693_v33 = vadd.f32 %v1692_v29, %v1524_v28  ;;  %473 = vperm.xlu2 %3286, %v327_v22   ;;  %v2821_v30 = vor.u32 %v3143_v18, %v2820_v17 }
  0xdd   : > { %3301 = vpow2.f32 %v1983_v23 }
  0xde   : > { %v1357_v34 = vadd.f32 %v1356_v32, %v1188_v31  ;;  %v1852_v35 = vsub.f32 0.0, %v1693_v33 }
  0xe0   : > { %v1853_v39 = vsub.f32 0.0, %v1357_v34  ;;  %v3296_v42 = vpop.eup %3295  ;;  %v1985_v43 = vmul.f32 1.442695, %v1852_v35 }
  0xe1   : > { %v3298_v44 = vpop.eup %3297  ;;  %v2234_v45 = vadd.f32 1.0, %v3296_v42  ;;  %v1525_v47 = vpop.f32.mrf.mxu2 }
  0xe2   : > { %v1987_v46 = vmul.f32 1.442695, %v1853_v39  ;;  %v3300_v49 = vpop.eup %3299  ;;  %2488 = vst [vmem:[%s4270_s11 + $0x8] sm:$0xff] %v3298_v44  ;;  %3303 = vpow2.f32 %v1985_v43  ;;  %v1526_v50 = vadd.f32 %v1525_v47, %v389_v20  ;;  %v1694_v51 = vpop.f32.mrf.mxu3  ;;  %v3142_v20 = vld [vmem:[%s4832_s0 + $0xb4] sm:$0xf]  ;;  %v331_v44 = vld [vmem:[%s4833_s1 + $0xc0] sm:$0xff] }
  0xe3   : > { %v1190_v52 = vpop.f32.mrf.mxu0  ;;  %v3302_v54 = vpop.eup %3301  ;;  %2489 = vst [vmem:[%s4270_s11 + $0x10] sm:$0xff] %v3300_v49  ;;  %3305 = vrcp.f32 %v2234_v45  ;;  %v2825_v35 = vor.u32 %v3142_v20, %v2822_v21  ;;  %493 = vperm.xlu0 %3284, %v331_v44  }
  0xe4   : > { %v1191_v55 = vadd.f32 %v1190_v52, %v394_v36  ;;  %v1359_v56 = vpop.f32.mrf.mxu1  ;;  %v2235_v57 = vadd.f32 1.0, %v3302_v54  ;;  %3307 = vpow2.f32 %v1987_v46  ;;  %v1695_v58 = vadd.f32 %v1694_v51, %v1526_v50  ;;  %1229 = vmatmul.bf16.gmra.mxu0 %v2813_v48  ;;  %v409_v47 = vpop.permute.xlu1 %408  ;;  %v332_v52 = vld [vmem:[%s4833_s1 + $0xc8] sm:$0xff] }
  0xe5   : > { %1398 = vmatmul.bf16.gmra.mxu1 %v2817_v53  ;;  %498 = vperm.xlu1 %3285, %v332_v52  }
  0xe6   : > { %v1360_v59 = vadd.f32 %v1359_v56, %v1191_v55  ;;  %3309 = vrcp.f32 %v2235_v57  ;;  %v1854_v60 = vsub.f32 0.0, %v1695_v58  ;;  %1567 = vmatmul.bf16.gmra.mxu2 %v2813_v48 }
  0xe7   : > { %1736 = vmatmul.bf16.gmra.mxu3 %v2817_v53 }
  0xe8   : > { %v1855_v61 = vsub.f32 0.0, %v1360_v59  ;;  %v3304_v63 = vpop.eup %3303  ;;  %v1989_v0 = vmul.f32 1.442695, %v1854_v60 }
  0xe9   : > { %v3306_v2 = vpop.eup %3305  ;;  %v2236_v3 = vadd.f32 1.0, %v3304_v63  ;;  %v1528_v5 = vpop.f32.mrf.mxu2 }
  0xea   : > { %v1991_v4 = vmul.f32 1.442695, %v1855_v61  ;;  %v3308_v6 = vpop.eup %3307  ;;  %2490 = vst [vmem:[%s4270_s11 + $0x18] sm:$0xff] %v3306_v2  ;;  %3311 = vpow2.f32 %v1989_v0  ;;  %v1529_v7 = vadd.f32 %v1528_v5, %v394_v36  ;;  %v1697_v8 = vpop.f32.mrf.mxu3  ;;  %v2828_v0 = vld [vmem:[%s4832_s0 + $0xc0] sm:$0xf] }
  0xeb   : > { %v1192_v9 = vpop.f32.mrf.mxu0  ;;  %3313 = vrcp.f32 %v2236_v3  ;;  %v2237_v10 = vadd.f32 1.0, %v3308_v6  ;;  %v3144_v3 = vld [vmem:[%s4832_s0 + $0xc4] sm:$0xf] }
  0xec   : > { %v1193_v11 = vadd.f32 %v1192_v9, %v399_v1  ;;  %v1361_v12 = vpop.f32.mrf.mxu1  ;;  %v3310_v13 = vpop.eup %3309  ;;  %3315 = vpow2.f32 %v1991_v4  ;;  %v1698_v14 = vadd.f32 %v1697_v8, %v1529_v7  ;;  %v2830_v4 = vld [vmem:[%s4832_s0 + $0xc8] sm:$0xf0] }
  0xed   : > { %2491 = vst [vmem:[%s4270_s11 + $0x20] sm:$0xff] %v3310_v13  ;;  %3317 = vrcp.f32 %v2237_v10  ;;  %v414_v7 = vpop.permute.xlu2 %413  ;;  %v330_v13 = vld [vmem:[%s4833_s1 + $0xb8] sm:$0xff]  ;;  %v2833_v18 = vor.u32 %v3144_v3, %v2830_v4 }
  0xee   : > { %v1362_v15 = vadd.f32 %v1361_v12, %v1193_v11  ;;  %v1856_v16 = vsub.f32 0.0, %v1698_v14  ;;  %488 = vperm.xlu2 %3286, %v330_v13  }
  0xf0   : > { %v1857_v19 = vsub.f32 0.0, %v1362_v15  ;;  %v3312_v23 = vpop.eup %3311  ;;  %v1993_v24 = vmul.f32 1.442695, %v1856_v16 }
  0xf1   : > { %v3314_v26 = vpop.eup %3313  ;;  %v2238_v27 = vadd.f32 1.0, %v3312_v23  ;;  %v1530_v29 = vpop.f32.mrf.mxu2 }
  0xf2   : > { %v1995_v28 = vmul.f32 1.442695, %v1857_v19  ;;  %v3316_v31 = vpop.eup %3315  ;;  %2492 = vst [vmem:[%s4270_s11 + $0x28] sm:$0xff] %v3314_v26  ;;  %3319 = vpow2.f32 %v1993_v24  ;;  %v1531_v32 = vadd.f32 %v1530_v29, %v399_v1  ;;  %v1699_v33 = vpop.f32.mrf.mxu3  ;;  %v3145_v1 = vld [vmem:[%s4832_s0 + $0xc4] sm:$0xf0] }
  0xf3   : > { %v1195_v34 = vpop.f32.mrf.mxu0  ;;  %v3318_v36 = vpop.eup %3317  ;;  %3321 = vrcp.f32 %v2238_v27  ;;  %v2239_v37 = vadd.f32 1.0, %v3316_v31  ;;  %v2829_v12 = vor.u32 %v3145_v1, %v2828_v0 }
  0xf4   : > { %v1364_v38 = vpop.f32.mrf.mxu1  ;;  %v1196_v39 = vadd.f32 %v1195_v34, %v404_v25  ;;  %2493 = vst [vmem:[%s4270_s11 + $0x30] sm:$0xff] %v3318_v36  ;;  %3323 = vpow2.f32 %v1995_v28  ;;  %v1700_v40 = vadd.f32 %v1699_v33, %v1531_v32  ;;  %1234 = vmatmul.bf16.gmra.mxu0 %v2821_v30  ;;  %v419_v29 = vpop.permute.xlu0 %418  ;;  %v334_v34 = vld [vmem:[%s4833_s1 + $0xd8] sm:$0xff] }
  0xf5   : > { %3325 = vrcp.f32 %v2239_v37  ;;  %1403 = vmatmul.bf16.gmra.mxu1 %v2825_v35  ;;  %508 = vperm.xlu0 %3284, %v334_v34  }
  0xf6   : > { %v1365_v41 = vadd.f32 %v1364_v38, %v1196_v39  ;;  %v1858_v42 = vsub.f32 0.0, %v1700_v40  ;;  %1572 = vmatmul.bf16.gmra.mxu2 %v2821_v30 }
  0xf7   : > { %1741 = vmatmul.bf16.gmra.mxu3 %v2825_v35 }
  0xf8   : > { %v1859_v43 = vsub.f32 0.0, %v1365_v41  ;;  %v3320_v45 = vpop.eup %3319  ;;  %v1997_v46 = vmul.f32 1.442695, %v1858_v42 }
  0xf9   : > { %v3322_v48 = vpop.eup %3321  ;;  %v2240_v49 = vadd.f32 1.0, %v3320_v45  ;;  %v1533_v51 = vpop.f32.mrf.mxu2 }
  0xfa   : > { %v1999_v50 = vmul.f32 1.442695, %v1859_v43  ;;  %v3324_v53 = vpop.eup %3323  ;;  %2494 = vst [vmem:[%s4270_s11 + $0x38] sm:$0xff] %v3322_v48  ;;  %3327 = vpow2.f32 %v1997_v46  ;;  %v1534_v54 = vadd.f32 %v1533_v51, %v404_v25  ;;  %v1702_v55 = vpop.f32.mrf.mxu3  ;;  %v2836_v46 = vld [vmem:[%s4832_s0 + $0xd0] sm:$0xf] }
  0xfb   : > { %v1197_v56 = vpop.f32.mrf.mxu0  ;;  %v3326_v57 = vpop.eup %3325  ;;  %3329 = vrcp.f32 %v2240_v49  ;;  %v2241_v58 = vadd.f32 1.0, %v3324_v53  ;;  %v3146_v49 = vld [vmem:[%s4832_s0 + $0xd4] sm:$0xf] }
  0xfc   : > { %v1198_v59 = vadd.f32 %v1197_v56, %v409_v47  ;;  %v1366_v60 = vpop.f32.mrf.mxu1  ;;  %2495 = vst [vmem:[%s4270_s11 + $0x40] sm:$0xff] %v3326_v57  ;;  %3331 = vpow2.f32 %v1999_v50  ;;  %v1703_v61 = vadd.f32 %v1702_v55, %v1534_v54  ;;  %v2838_v50 = vld [vmem:[%s4832_s0 + $0xd8] sm:$0xf0]  ;;  %v424_v53 = vpop.permute.xlu1 %423 }
  0xfd   : > { %3333 = vrcp.f32 %v2241_v58 }
  0xfe   : > { %v1367_v62 = vadd.f32 %v1366_v60, %v1198_v59  ;;  %v1860_v63 = vsub.f32 0.0, %v1703_v61 }
 0x100   : > { %v1861_v2 = vsub.f32 0.0, %v1367_v62  ;;  %v3328_v5 = vpop.eup %3327  ;;  %v2001_v6 = vmul.f32 1.442695, %v1860_v63  ;;  %v2841_v63 = vor.u32 %v3146_v49, %v2838_v50 }
 0x101   : > { %v3330_v8 = vpop.eup %3329  ;;  %v2242_v9 = vadd.f32 1.0, %v3328_v5  ;;  %v1535_v11 = vpop.f32.mrf.mxu2 }
 0x102   : > { %v2003_v10 = vmul.f32 1.442695, %v1861_v2  ;;  %v3332_v14 = vpop.eup %3331  ;;  %2496 = vst [vmem:[%s4270_s11 + $0x48] sm:$0xff] %v3330_v8  ;;  %3335 = vpow2.f32 %v2001_v6  ;;  %v1536_v15 = vadd.f32 %v1535_v11, %v409_v47  ;;  %v1704_v16 = vpop.f32.mrf.mxu3  ;;  %v3147_v47 = vld [vmem:[%s4832_s0 + $0xd4] sm:$0xf0]  ;;  %v335_v8 = vld [vmem:[%s4833_s1 + $0xe0] sm:$0xff] }
 0x103   : > { %v1200_v17 = vpop.f32.mrf.mxu0  ;;  %v3334_v19 = vpop.eup %3333  ;;  %3337 = vrcp.f32 %v2242_v9  ;;  %v2243_v20 = vadd.f32 1.0, %v3332_v14  ;;  %v2837_v58 = vor.u32 %v3147_v47, %v2836_v46  ;;  %513 = vperm.xlu1 %3285, %v335_v8  }
 0x104   : > { %v1369_v21 = vpop.f32.mrf.mxu1  ;;  %v1201_v22 = vadd.f32 %v1200_v17, %v414_v7  ;;  %2497 = vst [vmem:[%s4270_s11 + $0x50] sm:$0xff] %v3334_v19  ;;  %3339 = vpow2.f32 %v2003_v10  ;;  %v1705_v23 = vadd.f32 %v1704_v16, %v1536_v15  ;;  %1239 = vmatmul.bf16.gmra.mxu0 %v2829_v12  ;;  %v429_v11 = vpop.permute.xlu2 %428 }
 0x105   : > { %3341 = vrcp.f32 %v2243_v20  ;;  %1408 = vmatmul.bf16.gmra.mxu1 %v2833_v18 }
 0x106   : > { %v1370_v24 = vadd.f32 %v1369_v21, %v1201_v22  ;;  %v1862_v25 = vsub.f32 0.0, %v1705_v23  ;;  %1577 = vmatmul.bf16.gmra.mxu2 %v2829_v12 }
 0x107   : > { %1746 = vmatmul.bf16.gmra.mxu3 %v2833_v18 }
 0x108   : > { %v1863_v26 = vsub.f32 0.0, %v1370_v24  ;;  %v3336_v27 = vpop.eup %3335  ;;  %v2005_v28 = vmul.f32 1.442695, %v1862_v25 }
 0x109   : > { %v3338_v30 = vpop.eup %3337  ;;  %v2244_v31 = vadd.f32 1.0, %v3336_v27  ;;  %v1538_v33 = vpop.f32.mrf.mxu2  ;;  %v2844_v27 = vld [vmem:[%s4832_s0 + $0xe0] sm:$0xf] }
 0x10a   : > { %v2007_v32 = vmul.f32 1.442695, %v1863_v26  ;;  %v3340_v35 = vpop.eup %3339  ;;  %2498 = vst [vmem:[%s4270_s11 + $0x58] sm:$0xff] %v3338_v30  ;;  %3343 = vpow2.f32 %v2005_v28  ;;  %v1539_v36 = vadd.f32 %v1538_v33, %v414_v7  ;;  %v1707_v37 = vpop.f32.mrf.mxu3  ;;  %v3149_v28 = vld [vmem:[%s4832_s0 + $0xe4] sm:$0xf0] }
 0x10b   : > { %v1202_v38 = vpop.f32.mrf.mxu0  ;;  %v3342_v39 = vpop.eup %3341  ;;  %3345 = vrcp.f32 %v2244_v31  ;;  %v2245_v40 = vadd.f32 1.0, %v3340_v35  ;;  %v3148_v30 = vld [vmem:[%s4832_s0 + $0xe4] sm:$0xf]  ;;  %v2846_v31 = vld [vmem:[%s4832_s0 + $0xe8] sm:$0xf0] }
 0x10c   : > { %v1203_v41 = vadd.f32 %v1202_v38, %v419_v29  ;;  %v1371_v42 = vpop.f32.mrf.mxu1  ;;  %2499 = vst [vmem:[%s4270_s11 + $0x60] sm:$0xff] %v3342_v39  ;;  %3347 = vpow2.f32 %v2007_v32  ;;  %v1708_v43 = vadd.f32 %v1707_v37, %v1539_v36  ;;  %v333_v32 = vld [vmem:[%s4833_s1 + $0xd0] sm:$0xff]  ;;  %v434_v35 = vpop.permute.xlu0 %433 }
 0x10d   : > { %3349 = vrcp.f32 %v2245_v40  ;;  %503 = vperm.xlu2 %3286, %v333_v32   ;;  %v2845_v40 = vor.u32 %v3149_v28, %v2844_v27 }
 0x10e   : > { %v1372_v44 = vadd.f32 %v1371_v42, %v1203_v41  ;;  %v1864_v45 = vsub.f32 0.0, %v1708_v43 }
 0x110   : > { %v1865_v48 = vsub.f32 0.0, %v1372_v44  ;;  %v3344_v51 = vpop.eup %3343  ;;  %v2009_v52 = vmul.f32 1.442695, %v1864_v45  ;;  %v2849_v45 = vor.u32 %v3148_v30, %v2846_v31 }
 0x111   : > { %v3346_v54 = vpop.eup %3345  ;;  %v2246_v55 = vadd.f32 1.0, %v3344_v51  ;;  %v1540_v57 = vpop.f32.mrf.mxu2 }
 0x112   : > { %v2011_v56 = vmul.f32 1.442695, %v1865_v48  ;;  %v3348_v59 = vpop.eup %3347  ;;  %2500 = vst [vmem:[%s4270_s11 + $0x68] sm:$0xff] %v3346_v54  ;;  %3351 = vpow2.f32 %v2009_v52  ;;  %v1541_v60 = vadd.f32 %v1540_v57, %v419_v29  ;;  %v1709_v61 = vpop.f32.mrf.mxu3  ;;  %v337_v54 = vld [vmem:[%s4833_s1 + $0xf0] sm:$0xff] }
 0x113   : > { %v1205_v62 = vpop.f32.mrf.mxu0  ;;  %v3350_v0 = vpop.eup %3349  ;;  %3353 = vrcp.f32 %v2246_v55  ;;  %v2247_v1 = vadd.f32 1.0, %v3348_v59  ;;  %523 = vperm.xlu0 %3284, %v337_v54  }
 0x114   : > { %v1374_v2 = vpop.f32.mrf.mxu1  ;;  %v1206_v3 = vadd.f32 %v1205_v62, %v424_v53  ;;  %2501 = vst [vmem:[%s4270_s11 + $0x70] sm:$0xff] %v3350_v0  ;;  %3355 = vpow2.f32 %v2011_v56  ;;  %v1710_v4 = vadd.f32 %v1709_v61, %v1541_v60  ;;  %1244 = vmatmul.bf16.gmra.mxu0 %v2837_v58  ;;  %v439_v57 = vpop.permute.xlu1 %438  ;;  %v338_v62 = vld [vmem:[%s4833_s1 + $0xf8] sm:$0xff] }
 0x115   : > { %3357 = vrcp.f32 %v2247_v1  ;;  %1413 = vmatmul.bf16.gmra.mxu1 %v2841_v63  ;;  %528 = vperm.xlu1 %3285, %v338_v62  }
 0x116   : > { %v1375_v5 = vadd.f32 %v1374_v2, %v1206_v3  ;;  %v1866_v6 = vsub.f32 0.0, %v1710_v4  ;;  %1582 = vmatmul.bf16.gmra.mxu2 %v2837_v58 }
 0x117   : > { %1751 = vmatmul.bf16.gmra.mxu3 %v2841_v63 }
 0x118   : > { %v1867_v7 = vsub.f32 0.0, %v1375_v5  ;;  %v3352_v9 = vpop.eup %3351  ;;  %v2013_v10 = vmul.f32 1.442695, %v1866_v6 }
 0x119   : > { %v3354_v12 = vpop.eup %3353  ;;  %v2248_v13 = vadd.f32 1.0, %v3352_v9  ;;  %v1543_v15 = vpop.f32.mrf.mxu2 }
 0x11a   : > { %v2015_v14 = vmul.f32 1.442695, %v1867_v7  ;;  %v3356_v16 = vpop.eup %3355  ;;  %2502 = vst [vmem:[%s4270_s11 + $0x78] sm:$0xff] %v3354_v12  ;;  %3359 = vpow2.f32 %v2013_v10  ;;  %v1544_v17 = vadd.f32 %v1543_v15, %v424_v53  ;;  %v1712_v18 = vpop.f32.mrf.mxu3  ;;  %v2852_v10 = vld [vmem:[%s4832_s0 + $0xf0] sm:$0xf] }
 0x11b   : > { %v1207_v19 = vpop.f32.mrf.mxu0  ;;  %v3358_v20 = vpop.eup %3357  ;;  %3361 = vrcp.f32 %v2248_v13  ;;  %v2249_v21 = vadd.f32 1.0, %v3356_v16  ;;  %v3150_v13 = vld [vmem:[%s4832_s0 + $0xf4] sm:$0xf] }
 0x11c   : > { %v1208_v22 = vadd.f32 %v1207_v19, %v429_v11  ;;  %v1376_v23 = vpop.f32.mrf.mxu1  ;;  %2503 = vst [vmem:[%s4270_s11 + $0x80] sm:$0xff] %v3358_v20  ;;  %3363 = vpow2.f32 %v2015_v14  ;;  %v1713_v24 = vadd.f32 %v1712_v18, %v1544_v17  ;;  %v2854_v14 = vld [vmem:[%s4832_s0 + $0xf8] sm:$0xf0]  ;;  %v444_v17 = vpop.permute.xlu2 %443 }
 0x11d   : > { %3365 = vrcp.f32 %v2249_v21  ;;  %v2857_v28 = vor.u32 %v3150_v13, %v2854_v14 }
 0x11e   : > { %v1377_v25 = vadd.f32 %v1376_v23, %v1208_v22  ;;  %v1868_v26 = vsub.f32 0.0, %v1713_v24  ;;  %v336_v23 = vld [vmem:[%s4833_s1 + $0xe8] sm:$0xff] }
 0x11f   : > { %518 = vperm.xlu2 %3286, %v336_v23  }
 0x120   : > { %v1869_v29 = vsub.f32 0.0, %v1377_v25  ;;  %v3360_v33 = vpop.eup %3359  ;;  %v2017_v34 = vmul.f32 1.442695, %v1868_v26 }
 0x121   : > { %v3362_v36 = vpop.eup %3361  ;;  %v2250_v37 = vadd.f32 1.0, %v3360_v33  ;;  %v1545_v39 = vpop.f32.mrf.mxu2 }
 0x122   : > { %v2019_v38 = vmul.f32 1.442695, %v1869_v29  ;;  %v3364_v41 = vpop.eup %3363  ;;  %2504 = vst [vmem:[%s4270_s11 + $0x88] sm:$0xff] %v3362_v36  ;;  %3367 = vpow2.f32 %v2017_v34  ;;  %v1546_v42 = vadd.f32 %v1545_v39, %v429_v11  ;;  %v1714_v43 = vpop.f32.mrf.mxu3  ;;  %v3151_v11 = vld [vmem:[%s4832_s0 + $0xf4] sm:$0xf0] }
 0x123   : > { %v1210_v44 = vpop.f32.mrf.mxu0  ;;  %v3366_v46 = vpop.eup %3365  ;;  %3369 = vrcp.f32 %v2250_v37  ;;  %v2251_v47 = vadd.f32 1.0, %v3364_v41  ;;  %v2853_v22 = vor.u32 %v3151_v11, %v2852_v10  ;;  %v340_v37 = vld [vmem:[%s4833_s1 + $0x108] sm:$0xff] }
 0x124   : > { %v1379_v48 = vpop.f32.mrf.mxu1  ;;  %v1211_v49 = vadd.f32 %v1210_v44, %v434_v35  ;;  %2505 = vst [vmem:[%s4270_s11 + $0x90] sm:$0xff] %v3366_v46  ;;  %3371 = vpow2.f32 %v2019_v38  ;;  %v1715_v50 = vadd.f32 %v1714_v43, %v1546_v42  ;;  %1249 = vmatmul.bf16.gmra.mxu0 %v2845_v40  ;;  %538 = vperm.xlu0 %3284, %v340_v37   ;;  %v459_v23 = vpop.permute.xlu2 %458 }
 0x125   : > { %3373 = vrcp.f32 %v2251_v47  ;;  %1418 = vmatmul.bf16.gmra.mxu1 %v2849_v45 }
 0x126   : > { %v1380_v51 = vadd.f32 %v1379_v48, %v1211_v49  ;;  %v1870_v52 = vsub.f32 0.0, %v1715_v50  ;;  %1587 = vmatmul.bf16.gmra.mxu2 %v2845_v40  ;;  %v449_v40 = vpop.permute.xlu0 %448 }
 0x127   : > { %1756 = vmatmul.bf16.gmra.mxu3 %v2849_v45 }
 0x128   : > { %v1871_v53 = vsub.f32 0.0, %v1380_v51  ;;  %v3368_v55 = vpop.eup %3367  ;;  %v2021_v56 = vmul.f32 1.442695, %v1870_v52 }
 0x129   : > { %v3370_v58 = vpop.eup %3369  ;;  %v2252_v59 = vadd.f32 1.0, %v3368_v55  ;;  %v1548_v61 = vpop.f32.mrf.mxu2 }
 0x12a   : > { %v2023_v60 = vmul.f32 1.442695, %v1871_v53  ;;  %v3372_v63 = vpop.eup %3371  ;;  %2506 = vst [vmem:[%s4270_s11 + $0x98] sm:$0xff] %v3370_v58  ;;  %3375 = vpow2.f32 %v2021_v56  ;;  %v1549_v0 = vadd.f32 %v1548_v61, %v434_v35  ;;  %v1717_v1 = vpop.f32.mrf.mxu3  ;;  %v2860_v56 = vld [vmem:[%s4832_s0 + $0x100] sm:$0xf] }
 0x12b   : > { %v1212_v2 = vpop.f32.mrf.mxu0  ;;  %v3374_v3 = vpop.eup %3373  ;;  %3377 = vrcp.f32 %v2252_v59  ;;  %v2253_v4 = vadd.f32 1.0, %v3372_v63  ;;  %v3152_v59 = vld [vmem:[%s4832_s0 + $0x104] sm:$0xf] }
 0x12c   : > { %v1213_v5 = vadd.f32 %v1212_v2, %v439_v57  ;;  %v1381_v6 = vpop.f32.mrf.mxu1  ;;  %2507 = vst [vmem:[%s4270_s11 + $0xa0] sm:$0xff] %v3374_v3  ;;  %3379 = vpow2.f32 %v2023_v60  ;;  %v1718_v7 = vadd.f32 %v1717_v1, %v1549_v0  ;;  %v2862_v60 = vld [vmem:[%s4832_s0 + $0x108] sm:$0xf0]  ;;  %v343_v61 = vld [vmem:[%s4833_s1 + $0x120] sm:$0xff]  ;;  %v454_v0 = vpop.permute.xlu1 %453 }
 0x12d   : > { %3381 = vrcp.f32 %v2253_v4  ;;  %553 = vperm.xlu0 %3284, %v343_v61   ;;  %v2865_v10 = vor.u32 %v3152_v59, %v2862_v60 }
 0x12e   : > { %v1382_v8 = vadd.f32 %v1381_v6, %v1213_v5  ;;  %v1872_v9 = vsub.f32 0.0, %v1718_v7 }
 0x130   : > { %v1873_v12 = vsub.f32 0.0, %v1382_v8  ;;  %v3376_v15 = vpop.eup %3375  ;;  %v2025_v16 = vmul.f32 1.442695, %v1872_v9 }
 0x131   : > { %v3378_v18 = vpop.eup %3377  ;;  %v2254_v19 = vadd.f32 1.0, %v3376_v15  ;;  %v1550_v21 = vpop.f32.mrf.mxu2 }
 0x132   : > { %v2027_v20 = vmul.f32 1.442695, %v1873_v12  ;;  %v3380_v24 = vpop.eup %3379  ;;  %2508 = vst [vmem:[%s4270_s11 + $0xa8] sm:$0xff] %v3378_v18  ;;  %3383 = vpow2.f32 %v2025_v16  ;;  %v1551_v25 = vadd.f32 %v1550_v21, %v439_v57  ;;  %v1719_v26 = vpop.f32.mrf.mxu3  ;;  %v3153_v57 = vld [vmem:[%s4832_s0 + $0x104] sm:$0xf0] }
 0x133   : > { %v1215_v27 = vpop.f32.mrf.mxu0  ;;  %v3382_v29 = vpop.eup %3381  ;;  %3385 = vrcp.f32 %v2254_v19  ;;  %v2255_v30 = vadd.f32 1.0, %v3380_v24  ;;  %v2861_v5 = vor.u32 %v3153_v57, %v2860_v56  ;;  %v341_v19 = vld [vmem:[%s4833_s1 + $0x110] sm:$0xff] }
 0x134   : > { %v1384_v31 = vpop.f32.mrf.mxu1  ;;  %v1216_v32 = vadd.f32 %v1215_v27, %v444_v17  ;;  %2509 = vst [vmem:[%s4270_s11 + $0xb0] sm:$0xff] %v3382_v29  ;;  %3387 = vpow2.f32 %v2027_v20  ;;  %v1720_v33 = vadd.f32 %v1719_v26, %v1551_v25  ;;  %1254 = vmatmul.bf16.gmra.mxu0 %v2853_v22  ;;  %v346_v20 = vld [vmem:[%s4833_s1 + $0x138] sm:$0xff]  ;;  %543 = vperm.xlu1 %3285, %v341_v19  }
 0x135   : > { %3389 = vrcp.f32 %v2255_v30  ;;  %1423 = vmatmul.bf16.gmra.mxu1 %v2857_v28  ;;  %568 = vperm.xlu0 %3284, %v346_v20  }
 0x136   : > { %v1385_v34 = vadd.f32 %v1384_v31, %v1216_v32  ;;  %v1874_v35 = vsub.f32 0.0, %v1720_v33  ;;  %1592 = vmatmul.bf16.gmra.mxu2 %v2853_v22 }
 0x137   : > { %1761 = vmatmul.bf16.gmra.mxu3 %v2857_v28 }
 0x138   : > { %v1875_v36 = vsub.f32 0.0, %v1385_v34  ;;  %v3384_v38 = vpop.eup %3383  ;;  %v2029_v39 = vmul.f32 1.442695, %v1874_v35 }
 0x139   : > { %v3386_v41 = vpop.eup %3385  ;;  %v2256_v42 = vadd.f32 1.0, %v3384_v38  ;;  %v1553_v44 = vpop.f32.mrf.mxu2  ;;  %v2868_v38 = vld [vmem:[%s4832_s0 + $0x110] sm:$0xf] }
 0x13a   : > { %v2031_v43 = vmul.f32 1.442695, %v1875_v36  ;;  %v3388_v45 = vpop.eup %3387  ;;  %2510 = vst [vmem:[%s4270_s11 + $0xb8] sm:$0xff] %v3386_v41  ;;  %3391 = vpow2.f32 %v2029_v39  ;;  %v1554_v46 = vadd.f32 %v1553_v44, %v444_v17  ;;  %v1722_v47 = vpop.f32.mrf.mxu3  ;;  %v3155_v39 = vld [vmem:[%s4832_s0 + $0x114] sm:$0xf0]  ;;  %v339_v44 = vld [vmem:[%s4833_s1 + $0x100] sm:$0xff] }
 0x13b   : > { %v1217_v48 = vpop.f32.mrf.mxu0  ;;  %v3390_v49 = vpop.eup %3389  ;;  %3393 = vrcp.f32 %v2256_v42  ;;  %v2257_v50 = vadd.f32 1.0, %v3388_v45  ;;  %v3154_v41 = vld [vmem:[%s4832_s0 + $0x114] sm:$0xf]  ;;  %v2870_v42 = vld [vmem:[%s4832_s0 + $0x118] sm:$0xf0]  ;;  %v344_v45 = vld [vmem:[%s4833_s1 + $0x128] sm:$0xff]  ;;  %533 = vperm.xlu2 %3286, %v339_v44  }
 0x13c   : > { %v1218_v51 = vadd.f32 %v1217_v48, %v449_v40  ;;  %v1386_v52 = vpop.f32.mrf.mxu1  ;;  %2511 = vst [vmem:[%s4270_s11 + $0xc0] sm:$0xff] %v3390_v49  ;;  %3395 = vpow2.f32 %v2031_v43  ;;  %v1723_v53 = vadd.f32 %v1722_v47, %v1554_v46  ;;  %v349_v46 = vld [vmem:[%s4833_s1 + $0x150] sm:$0xff]  ;;  %v464_v49 = vpop.permute.xlu0 %463  ;;  %558 = vperm.xlu1 %3285, %v344_v45   ;;  %v2873_v59 = vor.u32 %v3154_v41, %v2870_v42 }
 0x13d   : > { %3397 = vrcp.f32 %v2257_v50  ;;  %583 = vperm.xlu0 %3284, %v349_v46  }
 0x13e   : > { %v1387_v54 = vadd.f32 %v1386_v52, %v1218_v51  ;;  %v1876_v55 = vsub.f32 0.0, %v1723_v53 }
 0x140   : > { %v1877_v58 = vsub.f32 0.0, %v1387_v54  ;;  %v3392_v62 = vpop.eup %3391  ;;  %v2033_v63 = vmul.f32 1.442695, %v1876_v55  ;;  %v2869_v54 = vor.u32 %v3155_v39, %v2868_v38 }
 0x141   : > { %v3394_v1 = vpop.eup %3393  ;;  %v2258_v2 = vadd.f32 1.0, %v3392_v62  ;;  %v1555_v4 = vpop.f32.mrf.mxu2 }
 0x142   : > { %v2035_v3 = vmul.f32 1.442695, %v1877_v58  ;;  %v3396_v6 = vpop.eup %3395  ;;  %2512 = vst [vmem:[%s4270_s11 + $0xc8] sm:$0xff] %v3394_v1  ;;  %3399 = vpow2.f32 %v2033_v63  ;;  %v1556_v7 = vadd.f32 %v1555_v4, %v449_v40  ;;  %v1724_v8 = vpop.f32.mrf.mxu3  ;;  %v347_v4 = vld [vmem:[%s4833_s1 + $0x140] sm:$0xff] }
 0x143   : > { %v1220_v9 = vpop.f32.mrf.mxu0  ;;  %v3398_v11 = vpop.eup %3397  ;;  %3401 = vrcp.f32 %v2258_v2  ;;  %v2259_v12 = vadd.f32 1.0, %v3396_v6 }
 0x144   : > { %v1389_v13 = vpop.f32.mrf.mxu1  ;;  %v1221_v14 = vadd.f32 %v1220_v9, %v454_v0  ;;  %2513 = vst [vmem:[%s4270_s11 + $0xd0] sm:$0xff] %v3398_v11  ;;  %3403 = vpow2.f32 %v2035_v3  ;;  %v1725_v15 = vadd.f32 %v1724_v8, %v1556_v7  ;;  %1259 = vmatmul.bf16.gmra.mxu0 %v2861_v5  ;;  %v469_v8 = vpop.permute.xlu1 %468  ;;  %573 = vperm.xlu1 %3285, %v347_v4  }
 0x145   : > { %3405 = vrcp.f32 %v2259_v12  ;;  %1428 = vmatmul.bf16.gmra.mxu1 %v2865_v10 }
 0x146   : > { %v1390_v16 = vadd.f32 %v1389_v13, %v1221_v14  ;;  %v1878_v17 = vsub.f32 0.0, %v1725_v15  ;;  %1597 = vmatmul.bf16.gmra.mxu2 %v2861_v5  ;;  %v352_v5 = vld [vmem:[%s4833_s1 + $0x168] sm:$0xff] }
 0x147   : > { %1766 = vmatmul.bf16.gmra.mxu3 %v2865_v10  ;;  %598 = vperm.xlu0 %3284, %v352_v5  }
 0x148   : > { %v1879_v18 = vsub.f32 0.0, %v1390_v16  ;;  %v3400_v21 = vpop.eup %3399  ;;  %v2037_v22 = vmul.f32 1.442695, %v1878_v17 }
 0x149   : > { %v3402_v24 = vpop.eup %3401  ;;  %v2260_v25 = vadd.f32 1.0, %v3400_v21  ;;  %v1558_v27 = vpop.f32.mrf.mxu2 }
 0x14a   : > { %v2039_v26 = vmul.f32 1.442695, %v1879_v18  ;;  %v3404_v28 = vpop.eup %3403  ;;  %2514 = vst [vmem:[%s4270_s11 + $0xd8] sm:$0xff] %v3402_v24  ;;  %3407 = vpow2.f32 %v2037_v22  ;;  %v1559_v29 = vadd.f32 %v1558_v27, %v454_v0  ;;  %v1727_v30 = vpop.f32.mrf.mxu3  ;;  %v3157_v24 = vld [vmem:[%s4832_s0 + $0x124] sm:$0xf0] }
 0x14b   : > { %v1222_v31 = vpop.f32.mrf.mxu0  ;;  %v3406_v32 = vpop.eup %3405  ;;  %3409 = vrcp.f32 %v2260_v25  ;;  %v2261_v33 = vadd.f32 1.0, %v3404_v28  ;;  %v2878_v27 = vld [vmem:[%s4832_s0 + $0x128] sm:$0xf0] }
 0x14c   : > { %v1223_v34 = vadd.f32 %v1222_v31, %v459_v23  ;;  %v1391_v35 = vpop.f32.mrf.mxu1  ;;  %2515 = vst [vmem:[%s4270_s11 + $0xe0] sm:$0xff] %v3406_v32  ;;  %3411 = vpow2.f32 %v2039_v26  ;;  %v1728_v36 = vadd.f32 %v1727_v30, %v1559_v29  ;;  %v3156_v26 = vld [vmem:[%s4832_s0 + $0x124] sm:$0xf]  ;;  %v342_v29 = vld [vmem:[%s4833_s1 + $0x118] sm:$0xff] }
 0x14d   : > { %3413 = vrcp.f32 %v2261_v33  ;;  %v350_v30 = vld [vmem:[%s4833_s1 + $0x158] sm:$0xff]  ;;  %v355_v31 = vld [vmem:[%s4833_s1 + $0x180] sm:$0xff]  ;;  %548 = vperm.xlu2 %3286, %v342_v29   ;;  %v2881_v44 = vor.u32 %v3156_v26, %v2878_v27 }
 0x14e   : > { %v1392_v37 = vadd.f32 %v1391_v35, %v1223_v34  ;;  %v1880_v40 = vsub.f32 0.0, %v1728_v36  ;;  %v474_v34 = vpop.permute.xlu2 %473  ;;  %588 = vperm.xlu1 %3285, %v350_v30  }
 0x14f   : > { %613 = vperm.xlu0 %3284, %v355_v31  }
 0x150   : > { %v1881_v43 = vsub.f32 0.0, %v1392_v37  ;;  %v3408_v47 = vpop.eup %3407  ;;  %v2041_v48 = vmul.f32 1.442695, %v1880_v40 }
 0x151   : > { %v3410_v50 = vpop.eup %3409  ;;  %v2262_v51 = vadd.f32 1.0, %v3408_v47  ;;  %v1560_v53 = vpop.f32.mrf.mxu2 }
 0x152   : > { %v2043_v52 = vmul.f32 1.442695, %v1881_v43  ;;  %v3412_v55 = vpop.eup %3411  ;;  %2516 = vst [vmem:[%s4270_s11 + $0xe8] sm:$0xff] %v3410_v50  ;;  %3415 = vpow2.f32 %v2041_v48  ;;  %v1561_v56 = vadd.f32 %v1560_v53, %v459_v23  ;;  %v1729_v57 = vpop.f32.mrf.mxu3  ;;  %v2876_v23 = vld [vmem:[%s4832_s0 + $0x120] sm:$0xf]  ;;  %v345_v53 = vld [vmem:[%s4833_s1 + $0x130] sm:$0xff] }
 0x153   : > { %v1225_v58 = vpop.f32.mrf.mxu0  ;;  %v3414_v60 = vpop.eup %3413  ;;  %3417 = vrcp.f32 %v2262_v51  ;;  %v2263_v61 = vadd.f32 1.0, %v3412_v55  ;;  %v2877_v39 = vor.u32 %v3157_v24, %v2876_v23  ;;  %v358_v55 = vld [vmem:[%s4833_s1 + $0x198] sm:$0xff] }
 0x154   : > { %v1394_v62 = vpop.f32.mrf.mxu1  ;;  %v1226_v63 = vadd.f32 %v1225_v58, %v464_v49  ;;  %2517 = vst [vmem:[%s4270_s11 + $0xf0] sm:$0xff] %v3414_v60  ;;  %3419 = vpow2.f32 %v2043_v52  ;;  %v1730_v0 = vadd.f32 %v1729_v57, %v1561_v56  ;;  %1264 = vmatmul.bf16.gmra.mxu0 %v2869_v54  ;;  %v479_v58 = vpop.permute.xlu0 %478 }
 0x155   : > { %3421 = vrcp.f32 %v2263_v61  ;;  %1433 = vmatmul.bf16.gmra.mxu1 %v2873_v59  ;;  %563 = vperm.xlu2 %3286, %v345_v53  }
 0x156   : > { %v1395_v1 = vadd.f32 %v1394_v62, %v1226_v63  ;;  %v1882_v2 = vsub.f32 0.0, %v1730_v0  ;;  %1602 = vmatmul.bf16.gmra.mxu2 %v2869_v54  ;;  %v353_v54 = vld [vmem:[%s4833_s1 + $0x170] sm:$0xff] }
 0x157   : > { %1771 = vmatmul.bf16.gmra.mxu3 %v2873_v59  ;;  %603 = vperm.xlu1 %3285, %v353_v54  }
 0x158   : > { %v1883_v3 = vsub.f32 0.0, %v1395_v1  ;;  %v3416_v6 = vpop.eup %3415  ;;  %v2045_v7 = vmul.f32 1.442695, %v1882_v2  ;;  %628 = vperm.xlu0 %3284, %v358_v55  }
 0x159   : > { %v3418_v9 = vpop.eup %3417  ;;  %v2264_v10 = vadd.f32 1.0, %v3416_v6  ;;  %v1563_v12 = vpop.f32.mrf.mxu2 }
 0x15a   : > { %v2047_v11 = vmul.f32 1.442695, %v1883_v3  ;;  %v3420_v13 = vpop.eup %3419  ;;  %2518 = vst [vmem:[%s4270_s11 + $0xf8] sm:$0xff] %v3418_v9  ;;  %3423 = vpow2.f32 %v2045_v7  ;;  %v1564_v14 = vadd.f32 %v1563_v12, %v464_v49  ;;  %v1732_v15 = vpop.f32.mrf.mxu3  ;;  %v2884_v9 = vld [vmem:[%s4832_s0 + $0x130] sm:$0xf] }
 0x15b   : > { %v1227_v16 = vpop.f32.mrf.mxu0  ;;  %v3422_v17 = vpop.eup %3421  ;;  %3425 = vrcp.f32 %v2264_v10  ;;  %v2265_v18 = vadd.f32 1.0, %v3420_v13  ;;  %v3159_v10 = vld [vmem:[%s4832_s0 + $0x134] sm:$0xf0]  ;;  %v3158_v12 = vld [vmem:[%s4832_s0 + $0x134] sm:$0xf] }
 0x15c   : > { %v1228_v19 = vadd.f32 %v1227_v16, %v469_v8  ;;  %v1396_v20 = vpop.f32.mrf.mxu1  ;;  %2519 = vst [vmem:[%s4270_s11 + $0x100] sm:$0xff] %v3422_v17  ;;  %3427 = vpow2.f32 %v2047_v11  ;;  %v1733_v21 = vadd.f32 %v1732_v15, %v1564_v14  ;;  %v2886_v13 = vld [vmem:[%s4832_s0 + $0x138] sm:$0xf0]  ;;  %v348_v15 = vld [vmem:[%s4833_s1 + $0x148] sm:$0xff]  ;;  %v361_v17 = vld [vmem:[%s4833_s1 + $0x1b0] sm:$0xff] }
 0x15d   : > { %3429 = vrcp.f32 %v2265_v18  ;;  %v356_v16 = vld [vmem:[%s4833_s1 + $0x188] sm:$0xff]  ;;  %578 = vperm.xlu2 %3286, %v348_v15   ;;  %v2889_v30 = vor.u32 %v3158_v12, %v2886_v13 }
 0x15e   : > { %v1397_v22 = vadd.f32 %v1396_v20, %v1228_v19  ;;  %v1884_v25 = vsub.f32 0.0, %v1733_v21  ;;  %v484_v20 = vpop.permute.xlu1 %483 }
 0x15f   : > { %618 = vperm.xlu1 %3285, %v356_v16  }
 0x160   : > { %v1885_v28 = vsub.f32 0.0, %v1397_v22  ;;  %v3424_v32 = vpop.eup %3423  ;;  %v2049_v33 = vmul.f32 1.442695, %v1884_v25  ;;  %v2885_v25 = vor.u32 %v3159_v10, %v2884_v9  ;;  %643 = vperm.xlu0 %3284, %v361_v17  }
 0x161   : > { %v3426_v35 = vpop.eup %3425  ;;  %v2266_v36 = vadd.f32 1.0, %v3424_v32  ;;  %v1565_v38 = vpop.f32.mrf.mxu2 }
 0x162   : > { %v2051_v37 = vmul.f32 1.442695, %v1885_v28  ;;  %v3428_v40 = vpop.eup %3427  ;;  %2520 = vst [vmem:[%s4270_s11 + $0x108] sm:$0xff] %v3426_v35  ;;  %3431 = vpow2.f32 %v2049_v33  ;;  %v1566_v41 = vadd.f32 %v1565_v38, %v469_v8  ;;  %v1734_v42 = vpop.f32.mrf.mxu3 }
 0x163   : > { %v1230_v43 = vpop.f32.mrf.mxu0  ;;  %v3430_v45 = vpop.eup %3429  ;;  %3433 = vrcp.f32 %v2266_v36  ;;  %v2267_v46 = vadd.f32 1.0, %v3428_v40  ;;  %v359_v40 = vld [vmem:[%s4833_s1 + $0x1a0] sm:$0xff] }
 0x164   : > { %v1399_v47 = vpop.f32.mrf.mxu1  ;;  %v1231_v48 = vadd.f32 %v1230_v43, %v474_v34  ;;  %2521 = vst [vmem:[%s4270_s11 + $0x110] sm:$0xff] %v3430_v45  ;;  %3435 = vpow2.f32 %v2051_v37  ;;  %v1735_v49 = vadd.f32 %v1734_v42, %v1566_v41  ;;  %1269 = vmatmul.bf16.gmra.mxu0 %v2877_v39  ;;  %v364_v41 = vld [vmem:[%s4833_s1 + $0x1c8] sm:$0xff] }
 0x165   : > { %3437 = vrcp.f32 %v2267_v46  ;;  %1438 = vmatmul.bf16.gmra.mxu1 %v2881_v44 }
 0x166   : > { %v1400_v50 = vadd.f32 %v1399_v47, %v1231_v48  ;;  %v1886_v51 = vsub.f32 0.0, %v1735_v49  ;;  %1607 = vmatmul.bf16.gmra.mxu2 %v2877_v39  ;;  %v351_v39 = vld [vmem:[%s4833_s1 + $0x160] sm:$0xff] }
 0x167   : > { %1776 = vmatmul.bf16.gmra.mxu3 %v2881_v44  ;;  %v489_v44 = vpop.permute.xlu2 %488  ;;  %593 = vperm.xlu2 %3286, %v351_v39  }
 0x168   : > { %v1887_v52 = vsub.f32 0.0, %v1400_v50  ;;  %v3432_v56 = vpop.eup %3431  ;;  %v2053_v57 = vmul.f32 1.442695, %v1886_v51  ;;  %633 = vperm.xlu1 %3285, %v359_v40   ;;  %658 = vperm.xlu0 %3284, %v364_v41  }
 0x169   : > { %v3434_v59 = vpop.eup %3433  ;;  %v2268_v60 = vadd.f32 1.0, %v3432_v56  ;;  %v1568_v62 = vpop.f32.mrf.mxu2 }
 0x16a   : > { %v2055_v61 = vmul.f32 1.442695, %v1887_v52  ;;  %v3436_v63 = vpop.eup %3435  ;;  %2522 = vst [vmem:[%s4270_s11 + $0x118] sm:$0xff] %v3434_v59  ;;  %3439 = vpow2.f32 %v2053_v57  ;;  %v1569_v0 = vadd.f32 %v1568_v62, %v474_v34  ;;  %v1737_v1 = vpop.f32.mrf.mxu3  ;;  %v2892_v59 = vld [vmem:[%s4832_s0 + $0x140] sm:$0xf] }
 0x16b   : > { %v1232_v2 = vpop.f32.mrf.mxu0  ;;  %v3438_v3 = vpop.eup %3437  ;;  %3441 = vrcp.f32 %v2268_v60  ;;  %v2269_v4 = vadd.f32 1.0, %v3436_v63  ;;  %v3161_v60 = vld [vmem:[%s4832_s0 + $0x144] sm:$0xf0]  ;;  %v3160_v62 = vld [vmem:[%s4832_s0 + $0x144] sm:$0xf] }
 0x16c   : > { %v1233_v5 = vadd.f32 %v1232_v2, %v479_v58  ;;  %v1401_v6 = vpop.f32.mrf.mxu1  ;;  %2523 = vst [vmem:[%s4270_s11 + $0x120] sm:$0xff] %v3438_v3  ;;  %3443 = vpow2.f32 %v2055_v61  ;;  %v1738_v7 = vadd.f32 %v1737_v1, %v1569_v0  ;;  %v2894_v63 = vld [vmem:[%s4832_s0 + $0x148] sm:$0xf0]  ;;  %v354_v1 = vld [vmem:[%s4833_s1 + $0x178] sm:$0xff]  ;;  %v367_v3 = vld [vmem:[%s4833_s1 + $0x1e0] sm:$0xff] }
 0x16d   : > { %3445 = vrcp.f32 %v2269_v4  ;;  %v362_v2 = vld [vmem:[%s4833_s1 + $0x1b8] sm:$0xff]  ;;  %v2897_v16 = vor.u32 %v3160_v62, %v2894_v63 }
 0x16e   : > { %v1402_v8 = vadd.f32 %v1401_v6, %v1233_v5  ;;  %v1888_v11 = vsub.f32 0.0, %v1738_v7  ;;  %v494_v6 = vpop.permute.xlu0 %493 }
 0x16f   : > { %608 = vperm.xlu2 %3286, %v354_v1  }
 0x170   : > { %v1889_v14 = vsub.f32 0.0, %v1402_v8  ;;  %v3440_v18 = vpop.eup %3439  ;;  %v2057_v19 = vmul.f32 1.442695, %v1888_v11  ;;  %648 = vperm.xlu1 %3285, %v362_v2   ;;  %v2893_v11 = vor.u32 %v3161_v60, %v2892_v59  ;;  %673 = vperm.xlu0 %3284, %v367_v3  }
 0x171   : > { %v3442_v21 = vpop.eup %3441  ;;  %v2270_v22 = vadd.f32 1.0, %v3440_v18  ;;  %v1570_v24 = vpop.f32.mrf.mxu2 }
 0x172   : > { %v2059_v23 = vmul.f32 1.442695, %v1889_v14  ;;  %v3444_v26 = vpop.eup %3443  ;;  %2524 = vst [vmem:[%s4270_s11 + $0x128] sm:$0xff] %v3442_v21  ;;  %3447 = vpow2.f32 %v2057_v19  ;;  %v1571_v27 = vadd.f32 %v1570_v24, %v479_v58  ;;  %v1739_v28 = vpop.f32.mrf.mxu3 }
 0x173   : > { %v1235_v29 = vpop.f32.mrf.mxu0  ;;  %v3446_v31 = vpop.eup %3445  ;;  %3449 = vrcp.f32 %v2270_v22  ;;  %v2271_v32 = vadd.f32 1.0, %v3444_v26  ;;  %v365_v26 = vld [vmem:[%s4833_s1 + $0x1d0] sm:$0xff] }
 0x174   : > { %v1404_v33 = vpop.f32.mrf.mxu1  ;;  %v1236_v34 = vadd.f32 %v1235_v29, %v484_v20  ;;  %2525 = vst [vmem:[%s4270_s11 + $0x130] sm:$0xff] %v3446_v31  ;;  %3451 = vpow2.f32 %v2059_v23  ;;  %v1740_v35 = vadd.f32 %v1739_v28, %v1571_v27  ;;  %1274 = vmatmul.bf16.gmra.mxu0 %v2885_v25  ;;  %v370_v27 = vld [vmem:[%s4833_s1 + $0x1f8] sm:$0xff] }
 0x175   : > { %3453 = vrcp.f32 %v2271_v32  ;;  %1443 = vmatmul.bf16.gmra.mxu1 %v2889_v30 }
 0x176   : > { %v1405_v36 = vadd.f32 %v1404_v33, %v1236_v34  ;;  %v1890_v37 = vsub.f32 0.0, %v1740_v35  ;;  %1612 = vmatmul.bf16.gmra.mxu2 %v2885_v25  ;;  %v357_v25 = vld [vmem:[%s4833_s1 + $0x190] sm:$0xff] }
 0x177   : > { %1781 = vmatmul.bf16.gmra.mxu3 %v2889_v30  ;;  %v499_v30 = vpop.permute.xlu1 %498  ;;  %623 = vperm.xlu2 %3286, %v357_v25  }
 0x178   : > { %v1891_v38 = vsub.f32 0.0, %v1405_v36  ;;  %v3448_v42 = vpop.eup %3447  ;;  %v2061_v43 = vmul.f32 1.442695, %v1890_v37  ;;  %663 = vperm.xlu1 %3285, %v365_v26   ;;  %688 = vperm.xlu0 %3284, %v370_v27  }
 0x179   : > { %v3450_v45 = vpop.eup %3449  ;;  %v2272_v46 = vadd.f32 1.0, %v3448_v42  ;;  %v1573_v48 = vpop.f32.mrf.mxu2 }
 0x17a   : > { %v2063_v47 = vmul.f32 1.442695, %v1891_v38  ;;  %v3452_v49 = vpop.eup %3451  ;;  %2526 = vst [vmem:[%s4270_s11 + $0x138] sm:$0xff] %v3450_v45  ;;  %3455 = vpow2.f32 %v2061_v43  ;;  %v1574_v50 = vadd.f32 %v1573_v48, %v484_v20  ;;  %v1742_v51 = vpop.f32.mrf.mxu3  ;;  %v2900_v45 = vld [vmem:[%s4832_s0 + $0x150] sm:$0xf] }
 0x17b   : > { %v1237_v52 = vpop.f32.mrf.mxu0  ;;  %v3454_v53 = vpop.eup %3453  ;;  %3457 = vrcp.f32 %v2272_v46  ;;  %v2273_v54 = vadd.f32 1.0, %v3452_v49  ;;  %v3162_v48 = vld [vmem:[%s4832_s0 + $0x154] sm:$0xf] }
 0x17c   : > { %v1238_v55 = vadd.f32 %v1237_v52, %v489_v44  ;;  %v1406_v56 = vpop.f32.mrf.mxu1  ;;  %2527 = vst [vmem:[%s4270_s11 + $0x140] sm:$0xff] %v3454_v53  ;;  %3459 = vpow2.f32 %v2063_v47  ;;  %v1743_v57 = vadd.f32 %v1742_v51, %v1574_v50  ;;  %v3163_v47 = vld [vmem:[%s4832_s0 + $0x154] sm:$0xf0]  ;;  %v2902_v50 = vld [vmem:[%s4832_s0 + $0x158] sm:$0xf0]  ;;  %v360_v51 = vld [vmem:[%s4833_s1 + $0x1a8] sm:$0xff] }
 0x17d   : > { %3461 = vrcp.f32 %v2273_v54  ;;  %v368_v52 = vld [vmem:[%s4833_s1 + $0x1e8] sm:$0xff]  ;;  %v2901_v60 = vor.u32 %v3163_v47, %v2900_v45  ;;  %v2905_v1 = vor.u32 %v3162_v48, %v2902_v50 }
 0x17e   : > { %v1407_v58 = vadd.f32 %v1406_v56, %v1238_v55  ;;  %v1892_v61 = vsub.f32 0.0, %v1743_v57  ;;  %v504_v55 = vpop.permute.xlu2 %503 }
 0x17f   : > { %638 = vperm.xlu2 %3286, %v360_v51  }
 0x180   : > { %v1893_v0 = vsub.f32 0.0, %v1407_v58  ;;  %v3456_v4 = vpop.eup %3455  ;;  %v2065_v5 = vmul.f32 1.442695, %v1892_v61  ;;  %678 = vperm.xlu1 %3285, %v368_v52  }
 0x181   : > { %v3458_v7 = vpop.eup %3457  ;;  %v2274_v8 = vadd.f32 1.0, %v3456_v4  ;;  %v1575_v10 = vpop.f32.mrf.mxu2 }
 0x182   : > { %v2067_v9 = vmul.f32 1.442695, %v1893_v0  ;;  %v3460_v12 = vpop.eup %3459  ;;  %2528 = vst [vmem:[%s4270_s11 + $0x148] sm:$0xff] %v3458_v7  ;;  %3463 = vpow2.f32 %v2065_v5  ;;  %v1576_v13 = vadd.f32 %v1575_v10, %v489_v44  ;;  %v1744_v14 = vpop.f32.mrf.mxu3  ;;  %v363_v10 = vld [vmem:[%s4833_s1 + $0x1c0] sm:$0xff] }
 0x183   : > { %v1240_v15 = vpop.f32.mrf.mxu0  ;;  %v3462_v17 = vpop.eup %3461  ;;  %3465 = vrcp.f32 %v2274_v8  ;;  %v2275_v18 = vadd.f32 1.0, %v3460_v12 }
 0x184   : > { %v1409_v19 = vpop.f32.mrf.mxu1  ;;  %v1241_v20 = vadd.f32 %v1240_v15, %v494_v6  ;;  %2529 = vst [vmem:[%s4270_s11 + $0x150] sm:$0xff] %v3462_v17  ;;  %3467 = vpow2.f32 %v2067_v9  ;;  %v1745_v21 = vadd.f32 %v1744_v14, %v1576_v13  ;;  %1279 = vmatmul.bf16.gmra.mxu0 %v2893_v11  ;;  %v509_v13 = vpop.permute.xlu0 %508 }
 0x185   : > { %3469 = vrcp.f32 %v2275_v18  ;;  %1448 = vmatmul.bf16.gmra.mxu1 %v2897_v16 }
 0x186   : > { %v1410_v22 = vadd.f32 %v1409_v19, %v1241_v20  ;;  %v1894_v23 = vsub.f32 0.0, %v1745_v21  ;;  %1617 = vmatmul.bf16.gmra.mxu2 %v2893_v11 }
 0x187   : > { %1786 = vmatmul.bf16.gmra.mxu3 %v2897_v16  ;;  %653 = vperm.xlu2 %3286, %v363_v10  }
 0x188   : > { %v1895_v24 = vsub.f32 0.0, %v1410_v22  ;;  %v3464_v28 = vpop.eup %3463  ;;  %v2069_v29 = vmul.f32 1.442695, %v1894_v23 }
 0x189   : > { %v3466_v31 = vpop.eup %3465  ;;  %v2276_v32 = vadd.f32 1.0, %v3464_v28  ;;  %v1578_v34 = vpop.f32.mrf.mxu2 }
 0x18a   : > { %v2071_v33 = vmul.f32 1.442695, %v1895_v24  ;;  %v3468_v35 = vpop.eup %3467  ;;  %2530 = vst [vmem:[%s4270_s11 + $0x158] sm:$0xff] %v3466_v31  ;;  %3471 = vpow2.f32 %v2069_v29  ;;  %v1579_v36 = vadd.f32 %v1578_v34, %v494_v6  ;;  %v1747_v37 = vpop.f32.mrf.mxu3  ;;  %v2908_v29 = vld [vmem:[%s4832_s0 + $0x160] sm:$0xf]  ;;  %v366_v34 = vld [vmem:[%s4833_s1 + $0x1d8] sm:$0xff] }
 0x18b   : > { %v1242_v38 = vpop.f32.mrf.mxu0  ;;  %v3470_v39 = vpop.eup %3469  ;;  %3473 = vrcp.f32 %v2276_v32  ;;  %v2277_v40 = vadd.f32 1.0, %v3468_v35  ;;  %v3164_v32 = vld [vmem:[%s4832_s0 + $0x164] sm:$0xf] }
 0x18c   : > { %v1243_v41 = vadd.f32 %v1242_v38, %v499_v30  ;;  %v1411_v42 = vpop.f32.mrf.mxu1  ;;  %2531 = vst [vmem:[%s4270_s11 + $0x160] sm:$0xff] %v3470_v39  ;;  %3475 = vpow2.f32 %v2071_v33  ;;  %v1748_v43 = vadd.f32 %v1747_v37, %v1579_v36  ;;  %v2910_v33 = vld [vmem:[%s4832_s0 + $0x168] sm:$0xf0]  ;;  %v514_v37 = vpop.permute.xlu1 %513 }
 0x18d   : > { %3477 = vrcp.f32 %v2277_v40  ;;  %v2913_v47 = vor.u32 %v3164_v32, %v2910_v33 }
 0x18e   : > { %v1412_v44 = vadd.f32 %v1411_v42, %v1243_v41  ;;  %v1896_v46 = vsub.f32 0.0, %v1748_v43 }
 0x18f   : > { %668 = vperm.xlu2 %3286, %v366_v34  }
 0x190   : > { %v1897_v49 = vsub.f32 0.0, %v1412_v44  ;;  %v3472_v53 = vpop.eup %3471  ;;  %v2073_v54 = vmul.f32 1.442695, %v1896_v46 }
 0x191   : > { %v3474_v56 = vpop.eup %3473  ;;  %v2278_v57 = vadd.f32 1.0, %v3472_v53  ;;  %v1580_v59 = vpop.f32.mrf.mxu2 }
 0x192   : > { %v2075_v58 = vmul.f32 1.442695, %v1897_v49  ;;  %v3476_v61 = vpop.eup %3475  ;;  %2532 = vst [vmem:[%s4270_s11 + $0x168] sm:$0xff] %v3474_v56  ;;  %3479 = vpow2.f32 %v2073_v54  ;;  %v1581_v62 = vadd.f32 %v1580_v59, %v499_v30  ;;  %v1749_v63 = vpop.f32.mrf.mxu3  ;;  %v3165_v30 = vld [vmem:[%s4832_s0 + $0x164] sm:$0xf0]  ;;  %v369_v56 = vld [vmem:[%s4833_s1 + $0x1f0] sm:$0xff] }
 0x193   : > { %v1245_v0 = vpop.f32.mrf.mxu0  ;;  %v3478_v2 = vpop.eup %3477  ;;  %3481 = vrcp.f32 %v2278_v57  ;;  %v2279_v3 = vadd.f32 1.0, %v3476_v61  ;;  %v2909_v42 = vor.u32 %v3165_v30, %v2908_v29 }
 0x194   : > { %v1414_v4 = vpop.f32.mrf.mxu1  ;;  %v1246_v5 = vadd.f32 %v1245_v0, %v504_v55  ;;  %2533 = vst [vmem:[%s4270_s11 + $0x170] sm:$0xff] %v3478_v2  ;;  %3483 = vpow2.f32 %v2075_v58  ;;  %v1750_v6 = vadd.f32 %v1749_v63, %v1581_v62  ;;  %1284 = vmatmul.bf16.gmra.mxu0 %v2901_v60  ;;  %v519_v59 = vpop.permute.xlu2 %518 }
 0x195   : > { %3485 = vrcp.f32 %v2279_v3  ;;  %1453 = vmatmul.bf16.gmra.mxu1 %v2905_v1 }
 0x196   : > { %v1415_v7 = vadd.f32 %v1414_v4, %v1246_v5  ;;  %v1898_v8 = vsub.f32 0.0, %v1750_v6  ;;  %1622 = vmatmul.bf16.gmra.mxu2 %v2901_v60 }
 0x197   : > { %1791 = vmatmul.bf16.gmra.mxu3 %v2905_v1  ;;  %683 = vperm.xlu2 %3286, %v369_v56   ;;  %v3169_v56 = vld [vmem:[%s4832_s0 + $0x184] sm:$0xf0] }
 0x198   : > { %v1899_v9 = vsub.f32 0.0, %v1415_v7  ;;  %v3480_v11 = vpop.eup %3479  ;;  %v2077_v12 = vmul.f32 1.442695, %v1898_v8 }
 0x199   : > { %v3482_v14 = vpop.eup %3481  ;;  %v2280_v15 = vadd.f32 1.0, %v3480_v11  ;;  %v1583_v17 = vpop.f32.mrf.mxu2  ;;  %v2916_v11 = vld [vmem:[%s4832_s0 + $0x170] sm:$0xf] }
 0x19a   : > { %v2079_v16 = vmul.f32 1.442695, %v1899_v9  ;;  %v3484_v18 = vpop.eup %3483  ;;  %2534 = vst [vmem:[%s4270_s11 + $0x178] sm:$0xff] %v3482_v14  ;;  %3487 = vpow2.f32 %v2077_v12  ;;  %v1584_v19 = vadd.f32 %v1583_v17, %v504_v55  ;;  %v1752_v20 = vpop.f32.mrf.mxu3  ;;  %v3167_v12 = vld [vmem:[%s4832_s0 + $0x174] sm:$0xf0] }
 0x19b   : > { %v1247_v21 = vpop.f32.mrf.mxu0  ;;  %v3486_v22 = vpop.eup %3485  ;;  %3489 = vrcp.f32 %v2280_v15  ;;  %v2281_v23 = vadd.f32 1.0, %v3484_v18  ;;  %v3166_v14 = vld [vmem:[%s4832_s0 + $0x174] sm:$0xf]  ;;  %v2918_v15 = vld [vmem:[%s4832_s0 + $0x178] sm:$0xf0] }
 0x19c   : > { %v1248_v24 = vadd.f32 %v1247_v21, %v509_v13  ;;  %v1416_v25 = vpop.f32.mrf.mxu1  ;;  %2535 = vst [vmem:[%s4270_s11 + $0x180] sm:$0xff] %v3486_v22  ;;  %3491 = vpow2.f32 %v2079_v16  ;;  %v1753_v26 = vadd.f32 %v1752_v20, %v1584_v19  ;;  %v524_v18 = vpop.permute.xlu0 %523 }
 0x19d   : > { %3493 = vrcp.f32 %v2281_v23  ;;  %v2917_v23 = vor.u32 %v3167_v12, %v2916_v11 }
 0x19e   : > { %v1417_v27 = vadd.f32 %v1416_v25, %v1248_v24  ;;  %v1900_v28 = vsub.f32 0.0, %v1753_v26 }
 0x1a0   : > { %v1901_v31 = vsub.f32 0.0, %v1417_v27  ;;  %v3488_v35 = vpop.eup %3487  ;;  %v2081_v36 = vmul.f32 1.442695, %v1900_v28  ;;  %v2921_v28 = vor.u32 %v3166_v14, %v2918_v15 }
 0x1a1   : > { %v3490_v38 = vpop.eup %3489  ;;  %v2282_v39 = vadd.f32 1.0, %v3488_v35  ;;  %v1585_v41 = vpop.f32.mrf.mxu2 }
 0x1a2   : > { %v2083_v40 = vmul.f32 1.442695, %v1901_v31  ;;  %v3492_v43 = vpop.eup %3491  ;;  %2536 = vst [vmem:[%s4270_s11 + $0x188] sm:$0xff] %v3490_v38  ;;  %3495 = vpow2.f32 %v2081_v36  ;;  %v1586_v44 = vadd.f32 %v1585_v41, %v509_v13  ;;  %v1754_v45 = vpop.f32.mrf.mxu3 }
 0x1a3   : > { %v1250_v46 = vpop.f32.mrf.mxu0  ;;  %v3494_v48 = vpop.eup %3493  ;;  %3497 = vrcp.f32 %v2282_v39  ;;  %v2283_v49 = vadd.f32 1.0, %v3492_v43 }
 0x1a4   : > { %v1419_v50 = vpop.f32.mrf.mxu1  ;;  %v1251_v51 = vadd.f32 %v1250_v46, %v514_v37  ;;  %2537 = vst [vmem:[%s4270_s11 + $0x190] sm:$0xff] %v3494_v48  ;;  %3499 = vpow2.f32 %v2083_v40  ;;  %v1755_v52 = vadd.f32 %v1754_v45, %v1586_v44  ;;  %1289 = vmatmul.bf16.gmra.mxu0 %v2909_v42  ;;  %v529_v39 = vpop.permute.xlu1 %528 }
 0x1a5   : > { %3501 = vrcp.f32 %v2283_v49  ;;  %1458 = vmatmul.bf16.gmra.mxu1 %v2913_v47 }
 0x1a6   : > { %v1420_v53 = vadd.f32 %v1419_v50, %v1251_v51  ;;  %v1902_v54 = vsub.f32 0.0, %v1755_v52  ;;  %1627 = vmatmul.bf16.gmra.mxu2 %v2909_v42 }
 0x1a7   : > { %1796 = vmatmul.bf16.gmra.mxu3 %v2913_v47 }
 0x1a8   : > { %v1903_v55 = vsub.f32 0.0, %v1420_v53  ;;  %v3496_v57 = vpop.eup %3495  ;;  %v2085_v58 = vmul.f32 1.442695, %v1902_v54 }
 0x1a9   : > { %v3498_v60 = vpop.eup %3497  ;;  %v2284_v61 = vadd.f32 1.0, %v3496_v57  ;;  %v1588_v63 = vpop.f32.mrf.mxu2 }
 0x1aa   : > { %v2087_v62 = vmul.f32 1.442695, %v1903_v55  ;;  %v3500_v0 = vpop.eup %3499  ;;  %2538 = vst [vmem:[%s4270_s11 + $0x198] sm:$0xff] %v3498_v60  ;;  %3503 = vpow2.f32 %v2085_v58  ;;  %v1589_v1 = vadd.f32 %v1588_v63, %v514_v37  ;;  %v1757_v2 = vpop.f32.mrf.mxu3  ;;  %v2924_v55 = vld [vmem:[%s4832_s0 + $0x180] sm:$0xf] }
 0x1ab   : > { %v1252_v3 = vpop.f32.mrf.mxu0  ;;  %v3502_v4 = vpop.eup %3501  ;;  %3505 = vrcp.f32 %v2284_v61  ;;  %v2285_v5 = vadd.f32 1.0, %v3500_v0  ;;  %v3168_v58 = vld [vmem:[%s4832_s0 + $0x184] sm:$0xf] }
 0x1ac   : > { %v1253_v6 = vadd.f32 %v1252_v3, %v519_v59  ;;  %v1421_v7 = vpop.f32.mrf.mxu1  ;;  %2539 = vst [vmem:[%s4270_s11 + $0x1a0] sm:$0xff] %v3502_v4  ;;  %3507 = vpow2.f32 %v2087_v62  ;;  %v1758_v8 = vadd.f32 %v1757_v2, %v1589_v1  ;;  %v534_v62 = vpop.permute.xlu2 %533  ;;  %v2925_v3 = vor.u32 %v3169_v56, %v2924_v55 }
 0x1ad   : > { %3509 = vrcp.f32 %v2285_v5 }
 0x1ae   : > { %v1422_v9 = vadd.f32 %v1421_v7, %v1253_v6  ;;  %v1904_v10 = vsub.f32 0.0, %v1758_v8 }
 0x1b0   : > { %v1905_v13 = vsub.f32 0.0, %v1422_v9  ;;  %v3504_v16 = vpop.eup %3503  ;;  %v2089_v17 = vmul.f32 1.442695, %v1904_v10 }
 0x1b1   : > { %v3506_v19 = vpop.eup %3505  ;;  %v2286_v20 = vadd.f32 1.0, %v3504_v16  ;;  %v1590_v22 = vpop.f32.mrf.mxu2 }
 0x1b2   : > { %v2091_v21 = vmul.f32 1.442695, %v1905_v13  ;;  %v3508_v24 = vpop.eup %3507  ;;  %2540 = vst [vmem:[%s4270_s11 + $0x1a8] sm:$0xff] %v3506_v19  ;;  %3511 = vpow2.f32 %v2089_v17  ;;  %v1591_v25 = vadd.f32 %v1590_v22, %v519_v59  ;;  %v1759_v26 = vpop.f32.mrf.mxu3  ;;  %v2926_v59 = vld [vmem:[%s4832_s0 + $0x188] sm:$0xf0] }
 0x1b3   : > { %v1255_v27 = vpop.f32.mrf.mxu0  ;;  %v3510_v29 = vpop.eup %3509  ;;  %3513 = vrcp.f32 %v2286_v20  ;;  %v2287_v30 = vadd.f32 1.0, %v3508_v24  ;;  %v2929_v8 = vor.u32 %v3168_v58, %v2926_v59 }
 0x1b4   : > { %v1424_v31 = vpop.f32.mrf.mxu1  ;;  %v1256_v32 = vadd.f32 %v1255_v27, %v524_v18  ;;  %2541 = vst [vmem:[%s4270_s11 + $0x1b0] sm:$0xff] %v3510_v29  ;;  %3515 = vpow2.f32 %v2091_v21  ;;  %v1760_v33 = vadd.f32 %v1759_v26, %v1591_v25  ;;  %1294 = vmatmul.bf16.gmra.mxu0 %v2917_v23  ;;  %v539_v22 = vpop.permute.xlu0 %538 }
 0x1b5   : > { %3517 = vrcp.f32 %v2287_v30  ;;  %1463 = vmatmul.bf16.gmra.mxu1 %v2921_v28 }
 0x1b6   : > { %v1425_v34 = vadd.f32 %v1424_v31, %v1256_v32  ;;  %v1906_v35 = vsub.f32 0.0, %v1760_v33  ;;  %1632 = vmatmul.bf16.gmra.mxu2 %v2917_v23 }
 0x1b7   : > { %1801 = vmatmul.bf16.gmra.mxu3 %v2921_v28 }
 0x1b8   : > { %v1907_v36 = vsub.f32 0.0, %v1425_v34  ;;  %v3512_v37 = vpop.eup %3511  ;;  %v2093_v38 = vmul.f32 1.442695, %v1906_v35  ;;  %v2932_v35 = vld [vmem:[%s4832_s0 + $0x190] sm:$0xf] }
 0x1b9   : > { %v3514_v40 = vpop.eup %3513  ;;  %v2288_v41 = vadd.f32 1.0, %v3512_v37  ;;  %v1593_v43 = vpop.f32.mrf.mxu2 }
 0x1ba   : > { %v2095_v42 = vmul.f32 1.442695, %v1907_v36  ;;  %v3516_v44 = vpop.eup %3515  ;;  %2542 = vst [vmem:[%s4270_s11 + $0x1b8] sm:$0xff] %v3514_v40  ;;  %3519 = vpow2.f32 %v2093_v38  ;;  %v1594_v45 = vadd.f32 %v1593_v43, %v524_v18  ;;  %v1762_v46 = vpop.f32.mrf.mxu3  ;;  %v3171_v36 = vld [vmem:[%s4832_s0 + $0x194] sm:$0xf0] }
 0x1bb   : > { %v1257_v47 = vpop.f32.mrf.mxu0  ;;  %v3518_v48 = vpop.eup %3517  ;;  %3521 = vrcp.f32 %v2288_v41  ;;  %v2289_v49 = vadd.f32 1.0, %v3516_v44  ;;  %v3170_v38 = vld [vmem:[%s4832_s0 + $0x194] sm:$0xf] }
 0x1bc   : > { %v1258_v50 = vadd.f32 %v1257_v47, %v529_v39  ;;  %v1426_v51 = vpop.f32.mrf.mxu1  ;;  %2543 = vst [vmem:[%s4270_s11 + $0x1c0] sm:$0xff] %v3518_v48  ;;  %3523 = vpow2.f32 %v2095_v42  ;;  %v1763_v52 = vadd.f32 %v1762_v46, %v1594_v45  ;;  %v544_v42 = vpop.permute.xlu1 %543  ;;  %v2933_v47 = vor.u32 %v3171_v36, %v2932_v35 }
 0x1bd   : > { %3525 = vrcp.f32 %v2289_v49 }
 0x1be   : > { %v1427_v53 = vadd.f32 %v1426_v51, %v1258_v50  ;;  %v1908_v54 = vsub.f32 0.0, %v1763_v52 }
 0x1c0   : > { %v1909_v57 = vsub.f32 0.0, %v1427_v53  ;;  %v3520_v60 = vpop.eup %3519  ;;  %v2097_v61 = vmul.f32 1.442695, %v1908_v54 }
 0x1c1   : > { %v3522_v63 = vpop.eup %3521  ;;  %v2290_v0 = vadd.f32 1.0, %v3520_v60  ;;  %v1595_v2 = vpop.f32.mrf.mxu2 }
 0x1c2   : > { %v2099_v1 = vmul.f32 1.442695, %v1909_v57  ;;  %v3524_v4 = vpop.eup %3523  ;;  %2544 = vst [vmem:[%s4270_s11 + $0x1c8] sm:$0xff] %v3522_v63  ;;  %3527 = vpow2.f32 %v2097_v61  ;;  %v1596_v5 = vadd.f32 %v1595_v2, %v529_v39  ;;  %v1764_v6 = vpop.f32.mrf.mxu3  ;;  %v2934_v39 = vld [vmem:[%s4832_s0 + $0x198] sm:$0xf0] }
 0x1c3   : > { %v1260_v7 = vpop.f32.mrf.mxu0  ;;  %v3526_v9 = vpop.eup %3525  ;;  %3529 = vrcp.f32 %v2290_v0  ;;  %v2291_v10 = vadd.f32 1.0, %v3524_v4  ;;  %v2937_v52 = vor.u32 %v3170_v38, %v2934_v39 }
 0x1c4   : > { %v1429_v11 = vpop.f32.mrf.mxu1  ;;  %v1261_v12 = vadd.f32 %v1260_v7, %v534_v62  ;;  %2545 = vst [vmem:[%s4270_s11 + $0x1d0] sm:$0xff] %v3526_v9  ;;  %3531 = vpow2.f32 %v2099_v1  ;;  %v1765_v13 = vadd.f32 %v1764_v6, %v1596_v5  ;;  %1299 = vmatmul.bf16.gmra.mxu0 %v2925_v3  ;;  %v549_v1 = vpop.permute.xlu2 %548 }
 0x1c5   : > { %3533 = vrcp.f32 %v2291_v10  ;;  %1468 = vmatmul.bf16.gmra.mxu1 %v2929_v8 }
 0x1c6   : > { %v1430_v14 = vadd.f32 %v1429_v11, %v1261_v12  ;;  %v1910_v15 = vsub.f32 0.0, %v1765_v13  ;;  %1637 = vmatmul.bf16.gmra.mxu2 %v2925_v3 }
 0x1c7   : > { %1806 = vmatmul.bf16.gmra.mxu3 %v2929_v8 }
 0x1c8   : > { %v1911_v16 = vsub.f32 0.0, %v1430_v14  ;;  %v3528_v17 = vpop.eup %3527  ;;  %v2101_v18 = vmul.f32 1.442695, %v1910_v15  ;;  %v2940_v15 = vld [vmem:[%s4832_s0 + $0x1a0] sm:$0xf] }
 0x1c9   : > { %v3530_v19 = vpop.eup %3529  ;;  %v2292_v20 = vadd.f32 1.0, %v3528_v17  ;;  %v1598_v23 = vpop.f32.mrf.mxu2 }
 0x1ca   : > { %v2103_v21 = vmul.f32 1.442695, %v1911_v16  ;;  %v3532_v24 = vpop.eup %3531  ;;  %2546 = vst [vmem:[%s4270_s11 + $0x1d8] sm:$0xff] %v3530_v19  ;;  %3535 = vpow2.f32 %v2101_v18  ;;  %v1599_v25 = vadd.f32 %v1598_v23, %v534_v62  ;;  %v1767_v26 = vpop.f32.mrf.mxu3  ;;  %v3173_v16 = vld [vmem:[%s4832_s0 + $0x1a4] sm:$0xf0] }
 0x1cb   : > { %v1262_v27 = vpop.f32.mrf.mxu0  ;;  %v3534_v28 = vpop.eup %3533  ;;  %3537 = vrcp.f32 %v2292_v20  ;;  %v2293_v29 = vadd.f32 1.0, %v3532_v24  ;;  %v3172_v18 = vld [vmem:[%s4832_s0 + $0x1a4] sm:$0xf]  ;;  %v2942_v19 = vld [vmem:[%s4832_s0 + $0x1a8] sm:$0xf0] }
 0x1cc   : > { %v1263_v30 = vadd.f32 %v1262_v27, %v539_v22  ;;  %v1431_v31 = vpop.f32.mrf.mxu1  ;;  %2547 = vst [vmem:[%s4270_s11 + $0x1e0] sm:$0xff] %v3534_v28  ;;  %3539 = vpow2.f32 %v2103_v21  ;;  %v1768_v32 = vadd.f32 %v1767_v26, %v1599_v25  ;;  %v554_v23 = vpop.permute.xlu0 %553  ;;  %v2941_v27 = vor.u32 %v3173_v16, %v2940_v15 }
 0x1cd   : > { %3541 = vrcp.f32 %v2293_v29 }
 0x1ce   : > { %v1432_v33 = vadd.f32 %v1431_v31, %v1263_v30  ;;  %v1912_v34 = vsub.f32 0.0, %v1768_v32  ;;  %v2945_v32 = vor.u32 %v3172_v18, %v2942_v19 }
 0x1d0   : > { %v1913_v37 = vsub.f32 0.0, %v1432_v33  ;;  %v3536_v40 = vpop.eup %3535  ;;  %v2105_v41 = vmul.f32 1.442695, %v1912_v34 }
 0x1d1   : > { %v3538_v43 = vpop.eup %3537  ;;  %v2294_v44 = vadd.f32 1.0, %v3536_v40  ;;  %v1600_v46 = vpop.f32.mrf.mxu2 }
 0x1d2   : > { %v2107_v45 = vmul.f32 1.442695, %v1913_v37  ;;  %v3540_v48 = vpop.eup %3539  ;;  %2548 = vst [vmem:[%s4270_s11 + $0x1e8] sm:$0xff] %v3538_v43  ;;  %3543 = vpow2.f32 %v2105_v41  ;;  %v1601_v49 = vadd.f32 %v1600_v46, %v539_v22  ;;  %v1769_v50 = vpop.f32.mrf.mxu3 }
 0x1d3   : > { %v1265_v51 = vpop.f32.mrf.mxu0  ;;  %v3542_v53 = vpop.eup %3541  ;;  %3545 = vrcp.f32 %v2294_v44  ;;  %v2295_v54 = vadd.f32 1.0, %v3540_v48 }
 0x1d4   : > { %v1434_v55 = vpop.f32.mrf.mxu1  ;;  %v1266_v56 = vadd.f32 %v1265_v51, %v544_v42  ;;  %2549 = vst [vmem:[%s4270_s11 + $0x1f0] sm:$0xff] %v3542_v53  ;;  %3547 = vpow2.f32 %v2107_v45  ;;  %v1770_v57 = vadd.f32 %v1769_v50, %v1601_v49  ;;  %1304 = vmatmul.bf16.gmra.mxu0 %v2933_v47  ;;  %v559_v45 = vpop.permute.xlu1 %558 }
 0x1d5   : > { %3549 = vrcp.f32 %v2295_v54  ;;  %1473 = vmatmul.bf16.gmra.mxu1 %v2937_v52 }
 0x1d6   : > { %v1435_v58 = vadd.f32 %v1434_v55, %v1266_v56  ;;  %v1914_v59 = vsub.f32 0.0, %v1770_v57  ;;  %1642 = vmatmul.bf16.gmra.mxu2 %v2933_v47 }
 0x1d7   : > { %1811 = vmatmul.bf16.gmra.mxu3 %v2937_v52 }
 0x1d8   : > { %v1915_v60 = vsub.f32 0.0, %v1435_v58  ;;  %v3544_v61 = vpop.eup %3543  ;;  %v2109_v62 = vmul.f32 1.442695, %v1914_v59  ;;  %v2948_v59 = vld [vmem:[%s4832_s0 + $0x1b0] sm:$0xf] }
 0x1d9   : > { %v3546_v63 = vpop.eup %3545  ;;  %v2296_v0 = vadd.f32 1.0, %v3544_v61  ;;  %v1603_v3 = vpop.f32.mrf.mxu2 }
 0x1da   : > { %v2111_v2 = vmul.f32 1.442695, %v1915_v60  ;;  %v3548_v4 = vpop.eup %3547  ;;  %2550 = vst [vmem:[%s4270_s11 + $0x1f8] sm:$0xff] %v3546_v63  ;;  %3551 = vpow2.f32 %v2109_v62  ;;  %v1604_v5 = vadd.f32 %v1603_v3, %v544_v42  ;;  %v1772_v6 = vpop.f32.mrf.mxu3  ;;  %v3175_v60 = vld [vmem:[%s4832_s0 + $0x1b4] sm:$0xf0] }
 0x1db   : > { %v1267_v7 = vpop.f32.mrf.mxu0  ;;  %v3550_v8 = vpop.eup %3549  ;;  %3553 = vrcp.f32 %v2296_v0  ;;  %v2297_v9 = vadd.f32 1.0, %v3548_v4  ;;  %v3174_v62 = vld [vmem:[%s4832_s0 + $0x1b4] sm:$0xf]  ;;  %v2950_v63 = vld [vmem:[%s4832_s0 + $0x1b8] sm:$0xf0] }
 0x1dc   : > { %v1268_v10 = vadd.f32 %v1267_v7, %v549_v1  ;;  %v1436_v11 = vpop.f32.mrf.mxu1  ;;  %2551 = vst [vmem:[%s4270_s11 + $0x200] sm:$0xff] %v3550_v8  ;;  %3555 = vpow2.f32 %v2111_v2  ;;  %v1773_v12 = vadd.f32 %v1772_v6, %v1604_v5  ;;  %v564_v3 = vpop.permute.xlu2 %563  ;;  %v2949_v7 = vor.u32 %v3175_v60, %v2948_v59 }
 0x1dd   : > { %3557 = vrcp.f32 %v2297_v9 }
 0x1de   : > { %v1437_v13 = vadd.f32 %v1436_v11, %v1268_v10  ;;  %v1916_v14 = vsub.f32 0.0, %v1773_v12  ;;  %v2953_v12 = vor.u32 %v3174_v62, %v2950_v63 }
 0x1e0   : > { %v1917_v17 = vsub.f32 0.0, %v1437_v13  ;;  %v3552_v20 = vpop.eup %3551  ;;  %v2113_v21 = vmul.f32 1.442695, %v1916_v14 }
 0x1e1   : > { %v3554_v22 = vpop.eup %3553  ;;  %v2298_v24 = vadd.f32 1.0, %v3552_v20  ;;  %v1605_v26 = vpop.f32.mrf.mxu2 }
 0x1e2   : > { %v2115_v25 = vmul.f32 1.442695, %v1917_v17  ;;  %v3556_v28 = vpop.eup %3555  ;;  %2552 = vst [vmem:[%s4270_s11 + $0x208] sm:$0xff] %v3554_v22  ;;  %3559 = vpow2.f32 %v2113_v21  ;;  %v1606_v29 = vadd.f32 %v1605_v26, %v549_v1  ;;  %v1774_v30 = vpop.f32.mrf.mxu3 }
 0x1e3   : > { %v1270_v31 = vpop.f32.mrf.mxu0  ;;  %v3558_v33 = vpop.eup %3557  ;;  %3561 = vrcp.f32 %v2298_v24  ;;  %v2299_v34 = vadd.f32 1.0, %v3556_v28 }
 0x1e4   : > { %v1271_v35 = vadd.f32 %v1270_v31, %v554_v23  ;;  %v1439_v36 = vpop.f32.mrf.mxu1  ;;  %2553 = vst [vmem:[%s4270_s11 + $0x210] sm:$0xff] %v3558_v33  ;;  %3563 = vpow2.f32 %v2115_v25  ;;  %v1775_v37 = vadd.f32 %v1774_v30, %v1606_v29  ;;  %1309 = vmatmul.bf16.gmra.mxu0 %v2941_v27  ;;  %v569_v24 = vpop.permute.xlu0 %568 }
 0x1e5   : > { %3565 = vrcp.f32 %v2299_v34  ;;  %1478 = vmatmul.bf16.gmra.mxu1 %v2945_v32 }
 0x1e6   : > { %v1440_v38 = vadd.f32 %v1439_v36, %v1271_v35  ;;  %v1918_v39 = vsub.f32 0.0, %v1775_v37  ;;  %1647 = vmatmul.bf16.gmra.mxu2 %v2941_v27 }
 0x1e7   : > { %1816 = vmatmul.bf16.gmra.mxu3 %v2945_v32 }
 0x1e8   : > { %v1919_v40 = vsub.f32 0.0, %v1440_v38  ;;  %v3560_v41 = vpop.eup %3559  ;;  %v2117_v42 = vmul.f32 1.442695, %v1918_v39  ;;  %v2956_v39 = vld [vmem:[%s4832_s0 + $0x1c0] sm:$0xf] }
 0x1e9   : > { %v3562_v43 = vpop.eup %3561  ;;  %v2300_v44 = vadd.f32 1.0, %v3560_v41  ;;  %v1608_v47 = vpop.f32.mrf.mxu2 }
 0x1ea   : > { %v2119_v46 = vmul.f32 1.442695, %v1919_v40  ;;  %v3564_v48 = vpop.eup %3563  ;;  %2554 = vst [vmem:[%s4270_s11 + $0x218] sm:$0xff] %v3562_v43  ;;  %3567 = vpow2.f32 %v2117_v42  ;;  %v1609_v49 = vadd.f32 %v1608_v47, %v554_v23  ;;  %v1777_v50 = vpop.f32.mrf.mxu3  ;;  %v3177_v40 = vld [vmem:[%s4832_s0 + $0x1c4] sm:$0xf0] }
 0x1eb   : > { %v1272_v51 = vpop.f32.mrf.mxu0  ;;  %v3566_v52 = vpop.eup %3565  ;;  %3569 = vrcp.f32 %v2300_v44  ;;  %v2301_v53 = vadd.f32 1.0, %v3564_v48  ;;  %v3176_v42 = vld [vmem:[%s4832_s0 + $0x1c4] sm:$0xf]  ;;  %v2958_v43 = vld [vmem:[%s4832_s0 + $0x1c8] sm:$0xf0] }
 0x1ec   : > { %v1273_v54 = vadd.f32 %v1272_v51, %v559_v45  ;;  %v1441_v55 = vpop.f32.mrf.mxu1  ;;  %2555 = vst [vmem:[%s4270_s11 + $0x220] sm:$0xff] %v3566_v52  ;;  %3571 = vpow2.f32 %v2119_v46  ;;  %v1778_v56 = vadd.f32 %v1777_v50, %v1609_v49  ;;  %v574_v47 = vpop.permute.xlu1 %573  ;;  %v2957_v51 = vor.u32 %v3177_v40, %v2956_v39 }
 0x1ed   : > { %3573 = vrcp.f32 %v2301_v53 }
 0x1ee   : > { %v1442_v57 = vadd.f32 %v1441_v55, %v1273_v54  ;;  %v1920_v58 = vsub.f32 0.0, %v1778_v56  ;;  %v2961_v56 = vor.u32 %v3176_v42, %v2958_v43 }
 0x1f0   : > { %v1921_v61 = vsub.f32 0.0, %v1442_v57  ;;  %v3568_v0 = vpop.eup %3567  ;;  %v2121_v1 = vmul.f32 1.442695, %v1920_v58 }
 0x1f1   : > { %v3570_v2 = vpop.eup %3569  ;;  %v2302_v4 = vadd.f32 1.0, %v3568_v0  ;;  %v1610_v6 = vpop.f32.mrf.mxu2 }
 0x1f2   : > { %v2123_v5 = vmul.f32 1.442695, %v1921_v61  ;;  %v3572_v8 = vpop.eup %3571  ;;  %2556 = vst [vmem:[%s4270_s11 + $0x228] sm:$0xff] %v3570_v2  ;;  %3575 = vpow2.f32 %v2121_v1  ;;  %v1611_v9 = vadd.f32 %v1610_v6, %v559_v45  ;;  %v1779_v10 = vpop.f32.mrf.mxu3 }
 0x1f3   : > { %v1275_v11 = vpop.f32.mrf.mxu0  ;;  %v3574_v13 = vpop.eup %3573  ;;  %3577 = vrcp.f32 %v2302_v4  ;;  %v2303_v14 = vadd.f32 1.0, %v3572_v8 }
 0x1f4   : > { %v1276_v15 = vadd.f32 %v1275_v11, %v564_v3  ;;  %v1444_v16 = vpop.f32.mrf.mxu1  ;;  %2557 = vst [vmem:[%s4270_s11 + $0x230] sm:$0xff] %v3574_v13  ;;  %3579 = vpow2.f32 %v2123_v5  ;;  %v1780_v17 = vadd.f32 %v1779_v10, %v1611_v9  ;;  %1314 = vmatmul.bf16.gmra.mxu0 %v2949_v7  ;;  %v579_v4 = vpop.permute.xlu2 %578 }
 0x1f5   : > { %3581 = vrcp.f32 %v2303_v14  ;;  %1483 = vmatmul.bf16.gmra.mxu1 %v2953_v12 }
 0x1f6   : > { %v1445_v18 = vadd.f32 %v1444_v16, %v1276_v15  ;;  %v1922_v19 = vsub.f32 0.0, %v1780_v17  ;;  %1652 = vmatmul.bf16.gmra.mxu2 %v2949_v7 }
 0x1f7   : > { %1821 = vmatmul.bf16.gmra.mxu3 %v2953_v12 }
 0x1f8   : > { %v1923_v20 = vsub.f32 0.0, %v1445_v18  ;;  %v3576_v21 = vpop.eup %3575  ;;  %v2125_v22 = vmul.f32 1.442695, %v1922_v19  ;;  %v2964_v19 = vld [vmem:[%s4832_s0 + $0x1d0] sm:$0xf] }
 0x1f9   : > { %v3578_v23 = vpop.eup %3577  ;;  %v2304_v25 = vadd.f32 1.0, %v3576_v21  ;;  %v1613_v27 = vpop.f32.mrf.mxu2 }
 0x1fa   : > { %v2127_v26 = vmul.f32 1.442695, %v1923_v20  ;;  %v3580_v28 = vpop.eup %3579  ;;  %2558 = vst [vmem:[%s4270_s11 + $0x238] sm:$0xff] %v3578_v23  ;;  %3583 = vpow2.f32 %v2125_v22  ;;  %v1614_v29 = vadd.f32 %v1613_v27, %v564_v3  ;;  %v1782_v30 = vpop.f32.mrf.mxu3  ;;  %v3179_v20 = vld [vmem:[%s4832_s0 + $0x1d4] sm:$0xf0] }
 0x1fb   : > { %v1277_v31 = vpop.f32.mrf.mxu0  ;;  %v3582_v32 = vpop.eup %3581  ;;  %3585 = vrcp.f32 %v2304_v25  ;;  %v2305_v33 = vadd.f32 1.0, %v3580_v28  ;;  %v3178_v22 = vld [vmem:[%s4832_s0 + $0x1d4] sm:$0xf]  ;;  %v2966_v23 = vld [vmem:[%s4832_s0 + $0x1d8] sm:$0xf0] }
 0x1fc   : > { %v1278_v34 = vadd.f32 %v1277_v31, %v569_v24  ;;  %v1446_v35 = vpop.f32.mrf.mxu1  ;;  %2559 = vst [vmem:[%s4270_s11 + $0x240] sm:$0xff] %v3582_v32  ;;  %3587 = vpow2.f32 %v2127_v26  ;;  %v1783_v36 = vadd.f32 %v1782_v30, %v1614_v29  ;;  %v584_v27 = vpop.permute.xlu0 %583  ;;  %v2965_v31 = vor.u32 %v3179_v20, %v2964_v19 }
 0x1fd   : > { %3589 = vrcp.f32 %v2305_v33 }
 0x1fe   : > { %v1447_v37 = vadd.f32 %v1446_v35, %v1278_v34  ;;  %v1924_v38 = vsub.f32 0.0, %v1783_v36  ;;  %v2969_v36 = vor.u32 %v3178_v22, %v2966_v23 }
 0x200   : > { %v1925_v41 = vsub.f32 0.0, %v1447_v37  ;;  %v3584_v44 = vpop.eup %3583  ;;  %v2129_v45 = vmul.f32 1.442695, %v1924_v38 }
 0x201   : > { %v3586_v46 = vpop.eup %3585  ;;  %v2306_v48 = vadd.f32 1.0, %v3584_v44  ;;  %v1615_v50 = vpop.f32.mrf.mxu2 }
 0x202   : > { %v2131_v49 = vmul.f32 1.442695, %v1925_v41  ;;  %v3588_v52 = vpop.eup %3587  ;;  %2560 = vst [vmem:[%s4270_s11 + $0x248] sm:$0xff] %v3586_v46  ;;  %3591 = vpow2.f32 %v2129_v45  ;;  %v1616_v53 = vadd.f32 %v1615_v50, %v569_v24  ;;  %v1784_v54 = vpop.f32.mrf.mxu3 }
 0x203   : > { %v1280_v55 = vpop.f32.mrf.mxu0  ;;  %v3590_v57 = vpop.eup %3589  ;;  %3593 = vrcp.f32 %v2306_v48  ;;  %v2307_v58 = vadd.f32 1.0, %v3588_v52 }
 0x204   : > { %v1281_v59 = vadd.f32 %v1280_v55, %v574_v47  ;;  %v1449_v60 = vpop.f32.mrf.mxu1  ;;  %2561 = vst [vmem:[%s4270_s11 + $0x250] sm:$0xff] %v3590_v57  ;;  %3595 = vpow2.f32 %v2131_v49  ;;  %v1785_v61 = vadd.f32 %v1784_v54, %v1616_v53  ;;  %1319 = vmatmul.bf16.gmra.mxu0 %v2957_v51  ;;  %v589_v48 = vpop.permute.xlu1 %588 }
 0x205   : > { %3597 = vrcp.f32 %v2307_v58  ;;  %1488 = vmatmul.bf16.gmra.mxu1 %v2961_v56 }
 0x206   : > { %v1450_v62 = vadd.f32 %v1449_v60, %v1281_v59  ;;  %v1926_v63 = vsub.f32 0.0, %v1785_v61  ;;  %1657 = vmatmul.bf16.gmra.mxu2 %v2957_v51 }
 0x207   : > { %1826 = vmatmul.bf16.gmra.mxu3 %v2961_v56 }
 0x208   : > { %v1927_v0 = vsub.f32 0.0, %v1450_v62  ;;  %v3592_v1 = vpop.eup %3591  ;;  %v2133_v2 = vmul.f32 1.442695, %v1926_v63  ;;  %v2972_v63 = vld [vmem:[%s4832_s0 + $0x1e0] sm:$0xf] }
 0x209   : > { %v3594_v3 = vpop.eup %3593  ;;  %v2308_v5 = vadd.f32 1.0, %v3592_v1  ;;  %v1618_v7 = vpop.f32.mrf.mxu2 }
 0x20a   : > { %v2135_v6 = vmul.f32 1.442695, %v1927_v0  ;;  %v3596_v8 = vpop.eup %3595  ;;  %2562 = vst [vmem:[%s4270_s11 + $0x258] sm:$0xff] %v3594_v3  ;;  %3599 = vpow2.f32 %v2133_v2  ;;  %v1619_v9 = vadd.f32 %v1618_v7, %v574_v47  ;;  %v1787_v10 = vpop.f32.mrf.mxu3  ;;  %v3181_v0 = vld [vmem:[%s4832_s0 + $0x1e4] sm:$0xf0] }
 0x20b   : > { %v1282_v11 = vpop.f32.mrf.mxu0  ;;  %v3598_v12 = vpop.eup %3597  ;;  %3601 = vrcp.f32 %v2308_v5  ;;  %v2309_v13 = vadd.f32 1.0, %v3596_v8  ;;  %v3180_v2 = vld [vmem:[%s4832_s0 + $0x1e4] sm:$0xf]  ;;  %v2974_v3 = vld [vmem:[%s4832_s0 + $0x1e8] sm:$0xf0] }
 0x20c   : > { %v1283_v14 = vadd.f32 %v1282_v11, %v579_v4  ;;  %v1451_v15 = vpop.f32.mrf.mxu1  ;;  %2563 = vst [vmem:[%s4270_s11 + $0x260] sm:$0xff] %v3598_v12  ;;  %3603 = vpow2.f32 %v2135_v6  ;;  %v1788_v16 = vadd.f32 %v1787_v10, %v1619_v9  ;;  %v594_v7 = vpop.permute.xlu2 %593  ;;  %v2973_v11 = vor.u32 %v3181_v0, %v2972_v63 }
 0x20d   : > { %3605 = vrcp.f32 %v2309_v13 }
 0x20e   : > { %v1452_v17 = vadd.f32 %v1451_v15, %v1283_v14  ;;  %v1928_v18 = vsub.f32 0.0, %v1788_v16  ;;  %v2977_v16 = vor.u32 %v3180_v2, %v2974_v3 }
 0x210   : > { %v1929_v21 = vsub.f32 0.0, %v1452_v17  ;;  %v3600_v24 = vpop.eup %3599  ;;  %v2137_v25 = vmul.f32 1.442695, %v1928_v18 }
 0x211   : > { %v3602_v26 = vpop.eup %3601  ;;  %v2310_v28 = vadd.f32 1.0, %v3600_v24  ;;  %v1620_v30 = vpop.f32.mrf.mxu2 }
 0x212   : > { %v2139_v29 = vmul.f32 1.442695, %v1929_v21  ;;  %v3604_v32 = vpop.eup %3603  ;;  %2564 = vst [vmem:[%s4270_s11 + $0x268] sm:$0xff] %v3602_v26  ;;  %3607 = vpow2.f32 %v2137_v25  ;;  %v1621_v33 = vadd.f32 %v1620_v30, %v579_v4  ;;  %v1789_v34 = vpop.f32.mrf.mxu3 }
 0x213   : > { %v1285_v35 = vpop.f32.mrf.mxu0  ;;  %v3606_v37 = vpop.eup %3605  ;;  %3609 = vrcp.f32 %v2310_v28  ;;  %v2311_v38 = vadd.f32 1.0, %v3604_v32 }
 0x214   : > { %v1286_v39 = vadd.f32 %v1285_v35, %v584_v27  ;;  %v1454_v40 = vpop.f32.mrf.mxu1  ;;  %2565 = vst [vmem:[%s4270_s11 + $0x270] sm:$0xff] %v3606_v37  ;;  %3611 = vpow2.f32 %v2139_v29  ;;  %v1790_v41 = vadd.f32 %v1789_v34, %v1621_v33  ;;  %1324 = vmatmul.bf16.gmra.mxu0 %v2965_v31  ;;  %v599_v28 = vpop.permute.xlu0 %598 }
 0x215   : > { %3613 = vrcp.f32 %v2311_v38  ;;  %1493 = vmatmul.bf16.gmra.mxu1 %v2969_v36 }
 0x216   : > { %v1455_v42 = vadd.f32 %v1454_v40, %v1286_v39  ;;  %v1930_v43 = vsub.f32 0.0, %v1790_v41  ;;  %1662 = vmatmul.bf16.gmra.mxu2 %v2965_v31 }
 0x217   : > { %1831 = vmatmul.bf16.gmra.mxu3 %v2969_v36 }
 0x218   : > { %v1931_v44 = vsub.f32 0.0, %v1455_v42  ;;  %v3608_v45 = vpop.eup %3607  ;;  %v2141_v46 = vmul.f32 1.442695, %v1930_v43  ;;  %v2980_v43 = vld [vmem:[%s4832_s0 + $0x1f0] sm:$0xf] }
 0x219   : > { %v3610_v47 = vpop.eup %3609  ;;  %v2312_v49 = vadd.f32 1.0, %v3608_v45  ;;  %v1623_v51 = vpop.f32.mrf.mxu2 }
 0x21a   : > { %v2143_v50 = vmul.f32 1.442695, %v1931_v44  ;;  %v3612_v52 = vpop.eup %3611  ;;  %2566 = vst [vmem:[%s4270_s11 + $0x278] sm:$0xff] %v3610_v47  ;;  %3615 = vpow2.f32 %v2141_v46  ;;  %v1624_v53 = vadd.f32 %v1623_v51, %v584_v27  ;;  %v1792_v54 = vpop.f32.mrf.mxu3  ;;  %v3183_v44 = vld [vmem:[%s4832_s0 + $0x1f4] sm:$0xf0] }
 0x21b   : > { %v1287_v55 = vpop.f32.mrf.mxu0  ;;  %v3614_v56 = vpop.eup %3613  ;;  %3617 = vrcp.f32 %v2312_v49  ;;  %v2313_v57 = vadd.f32 1.0, %v3612_v52  ;;  %v3182_v46 = vld [vmem:[%s4832_s0 + $0x1f4] sm:$0xf]  ;;  %v2982_v47 = vld [vmem:[%s4832_s0 + $0x1f8] sm:$0xf0] }
 0x21c   : > { %v1288_v58 = vadd.f32 %v1287_v55, %v589_v48  ;;  %v1456_v59 = vpop.f32.mrf.mxu1  ;;  %2567 = vst [vmem:[%s4270_s11 + $0x280] sm:$0xff] %v3614_v56  ;;  %3619 = vpow2.f32 %v2143_v50  ;;  %v1793_v60 = vadd.f32 %v1792_v54, %v1624_v53  ;;  %v604_v51 = vpop.permute.xlu1 %603  ;;  %v2981_v55 = vor.u32 %v3183_v44, %v2980_v43 }
 0x21d   : > { %3621 = vrcp.f32 %v2313_v57 }
 0x21e   : > { %v1457_v61 = vadd.f32 %v1456_v59, %v1288_v58  ;;  %v1932_v62 = vsub.f32 0.0, %v1793_v60  ;;  %v2985_v60 = vor.u32 %v3182_v46, %v2982_v47 }
 0x220   : > { %v1933_v1 = vsub.f32 0.0, %v1457_v61  ;;  %v3616_v4 = vpop.eup %3615  ;;  %v2145_v5 = vmul.f32 1.442695, %v1932_v62 }
 0x221   : > { %v3618_v6 = vpop.eup %3617  ;;  %v2314_v8 = vadd.f32 1.0, %v3616_v4  ;;  %v1625_v10 = vpop.f32.mrf.mxu2 }
 0x222   : > { %v2147_v9 = vmul.f32 1.442695, %v1933_v1  ;;  %v3620_v12 = vpop.eup %3619  ;;  %2568 = vst [vmem:[%s4270_s11 + $0x288] sm:$0xff] %v3618_v6  ;;  %3623 = vpow2.f32 %v2145_v5  ;;  %v1626_v13 = vadd.f32 %v1625_v10, %v589_v48  ;;  %v1794_v14 = vpop.f32.mrf.mxu3 }
 0x223   : > { %v1290_v15 = vpop.f32.mrf.mxu0  ;;  %v3622_v17 = vpop.eup %3621  ;;  %3625 = vrcp.f32 %v2314_v8  ;;  %v2315_v18 = vadd.f32 1.0, %v3620_v12 }
 0x224   : > { %v1291_v19 = vadd.f32 %v1290_v15, %v594_v7  ;;  %v1459_v20 = vpop.f32.mrf.mxu1  ;;  %2569 = vst [vmem:[%s4270_s11 + $0x290] sm:$0xff] %v3622_v17  ;;  %3627 = vpow2.f32 %v2147_v9  ;;  %v1795_v21 = vadd.f32 %v1794_v14, %v1626_v13  ;;  %1329 = vmatmul.bf16.gmra.mxu0 %v2973_v11  ;;  %v609_v8 = vpop.permute.xlu2 %608 }
 0x225   : > { %3629 = vrcp.f32 %v2315_v18  ;;  %1498 = vmatmul.bf16.gmra.mxu1 %v2977_v16  ;;  %v619_v46 = vpop.permute.xlu1 %618 }
 0x226   : > { %v1460_v22 = vadd.f32 %v1459_v20, %v1291_v19  ;;  %v1934_v23 = vsub.f32 0.0, %v1795_v21  ;;  %1667 = vmatmul.bf16.gmra.mxu2 %v2973_v11 }
 0x227   : > { %1836 = vmatmul.bf16.gmra.mxu3 %v2977_v16 }
 0x228   : > { %v1935_v24 = vsub.f32 0.0, %v1460_v22  ;;  %v3624_v25 = vpop.eup %3623  ;;  %v2149_v26 = vmul.f32 1.442695, %v1934_v23 }
 0x229   : > { %v3626_v27 = vpop.eup %3625  ;;  %v2316_v29 = vadd.f32 1.0, %v3624_v25  ;;  %v1628_v31 = vpop.f32.mrf.mxu2 }
 0x22a   : > { %v2151_v30 = vmul.f32 1.442695, %v1935_v24  ;;  %v3628_v32 = vpop.eup %3627  ;;  %2570 = vst [vmem:[%s4270_s11 + $0x298] sm:$0xff] %v3626_v27  ;;  %3631 = vpow2.f32 %v2149_v26  ;;  %v1629_v33 = vadd.f32 %v1628_v31, %v594_v7  ;;  %v1797_v34 = vpop.f32.mrf.mxu3 }
 0x22b   : > { %v1292_v35 = vpop.f32.mrf.mxu0  ;;  %v3630_v36 = vpop.eup %3629  ;;  %3633 = vrcp.f32 %v2316_v29  ;;  %v2317_v37 = vadd.f32 1.0, %v3628_v32 }
 0x22c   : > { %v1293_v38 = vadd.f32 %v1292_v35, %v599_v28  ;;  %v1461_v39 = vpop.f32.mrf.mxu1  ;;  %2571 = vst [vmem:[%s4270_s11 + $0x2a0] sm:$0xff] %v3630_v36  ;;  %3635 = vpow2.f32 %v2151_v30  ;;  %v1798_v40 = vadd.f32 %v1797_v34, %v1629_v33  ;;  %v614_v27 = vpop.permute.xlu0 %613 }
 0x22d   : > { %3637 = vrcp.f32 %v2317_v37 }
 0x22e   : > { %v1462_v41 = vadd.f32 %v1461_v39, %v1293_v38  ;;  %v1936_v42 = vsub.f32 0.0, %v1798_v40 }
 0x230   : > { %v1937_v45 = vsub.f32 0.0, %v1462_v41  ;;  %v3632_v48 = vpop.eup %3631  ;;  %v2153_v49 = vmul.f32 1.442695, %v1936_v42 }
 0x231   : > { %v3634_v50 = vpop.eup %3633  ;;  %v2318_v52 = vadd.f32 1.0, %v3632_v48  ;;  %v1630_v54 = vpop.f32.mrf.mxu2 }
 0x232   : > { %v2155_v53 = vmul.f32 1.442695, %v1937_v45  ;;  %v3636_v56 = vpop.eup %3635  ;;  %2572 = vst [vmem:[%s4270_s11 + $0x2a8] sm:$0xff] %v3634_v50  ;;  %3639 = vpow2.f32 %v2153_v49  ;;  %v1631_v57 = vadd.f32 %v1630_v54, %v599_v28  ;;  %v1799_v58 = vpop.f32.mrf.mxu3 }
 0x233   : > { %v1295_v59 = vpop.f32.mrf.mxu0  ;;  %v3638_v61 = vpop.eup %3637  ;;  %3641 = vrcp.f32 %v2318_v52  ;;  %v2319_v62 = vadd.f32 1.0, %v3636_v56 }
 0x234   : > { %v1296_v63 = vadd.f32 %v1295_v59, %v604_v51  ;;  %v1464_v0 = vpop.f32.mrf.mxu1  ;;  %2573 = vst [vmem:[%s4270_s11 + $0x2b0] sm:$0xff] %v3638_v61  ;;  %3643 = vpow2.f32 %v2155_v53  ;;  %v1800_v1 = vadd.f32 %v1799_v58, %v1631_v57  ;;  %1334 = vmatmul.bf16.gmra.mxu0 %v2981_v55 }
 0x235   : > { %3645 = vrcp.f32 %v2319_v62  ;;  %1503 = vmatmul.bf16.gmra.mxu1 %v2985_v60 }
 0x236   : > { %v1465_v2 = vadd.f32 %v1464_v0, %v1296_v63  ;;  %v1938_v3 = vsub.f32 0.0, %v1800_v1  ;;  %1672 = vmatmul.bf16.gmra.mxu2 %v2981_v55  ;;  %v624_v1 = vpop.permute.xlu2 %623 }
 0x237   : > { %1841 = vmatmul.bf16.gmra.mxu3 %v2985_v60 }
 0x238   : > { %v1939_v4 = vsub.f32 0.0, %v1465_v2  ;;  %v3640_v5 = vpop.eup %3639  ;;  %v2157_v6 = vmul.f32 1.442695, %v1938_v3 }
 0x239   : > { %v3642_v7 = vpop.eup %3641  ;;  %v2320_v9 = vadd.f32 1.0, %v3640_v5  ;;  %v1633_v11 = vpop.f32.mrf.mxu2 }
 0x23a   : > { %v2159_v10 = vmul.f32 1.442695, %v1939_v4  ;;  %v3644_v12 = vpop.eup %3643  ;;  %2574 = vst [vmem:[%s4270_s11 + $0x2b8] sm:$0xff] %v3642_v7  ;;  %3647 = vpow2.f32 %v2157_v6  ;;  %v1634_v13 = vadd.f32 %v1633_v11, %v604_v51  ;;  %v1802_v14 = vpop.f32.mrf.mxu3 }
 0x23b   : > { %v1297_v15 = vpop.f32.mrf.mxu0  ;;  %v3646_v16 = vpop.eup %3645  ;;  %3649 = vrcp.f32 %v2320_v9  ;;  %v2321_v17 = vadd.f32 1.0, %v3644_v12 }
 0x23c   : > { %v1298_v18 = vadd.f32 %v1297_v15, %v609_v8  ;;  %v1466_v19 = vpop.f32.mrf.mxu1  ;;  %2575 = vst [vmem:[%s4270_s11 + $0x2c0] sm:$0xff] %v3646_v16  ;;  %3651 = vpow2.f32 %v2159_v10  ;;  %v1803_v20 = vadd.f32 %v1802_v14, %v1634_v13 }
 0x23d   : > { %3653 = vrcp.f32 %v2321_v17 }
 0x23e   : > { %v1467_v21 = vadd.f32 %v1466_v19, %v1298_v18  ;;  %v1940_v22 = vsub.f32 0.0, %v1803_v20  ;;  %v629_v20 = vpop.permute.xlu0 %628 }
 0x240   : > { %v1941_v23 = vsub.f32 0.0, %v1467_v21  ;;  %v3648_v24 = vpop.eup %3647  ;;  %v2161_v25 = vmul.f32 1.442695, %v1940_v22 }
 0x241   : > { %v3650_v26 = vpop.eup %3649  ;;  %v2322_v28 = vadd.f32 1.0, %v3648_v24  ;;  %v1635_v30 = vpop.f32.mrf.mxu2 }
 0x242   : > { %v2163_v29 = vmul.f32 1.442695, %v1941_v23  ;;  %v3652_v31 = vpop.eup %3651  ;;  %2576 = vst [vmem:[%s4270_s11 + $0x2c8] sm:$0xff] %v3650_v26  ;;  %3655 = vpow2.f32 %v2161_v25  ;;  %v1636_v32 = vadd.f32 %v1635_v30, %v609_v8  ;;  %v1804_v33 = vpop.f32.mrf.mxu3 }
 0x243   : > { %v1300_v34 = vpop.f32.mrf.mxu0  ;;  %v3654_v35 = vpop.eup %3653  ;;  %3657 = vrcp.f32 %v2322_v28  ;;  %v2323_v36 = vadd.f32 1.0, %v3652_v31 }
 0x244   : > { %v1301_v37 = vadd.f32 %v1300_v34, %v614_v27  ;;  %v1469_v38 = vpop.f32.mrf.mxu1  ;;  %2577 = vst [vmem:[%s4270_s11 + $0x2d0] sm:$0xff] %v3654_v35  ;;  %3659 = vpow2.f32 %v2163_v29  ;;  %v1805_v39 = vadd.f32 %v1804_v33, %v1636_v32 }
 0x245   : > { %3661 = vrcp.f32 %v2323_v36 }
 0x246   : > { %v1470_v40 = vadd.f32 %v1469_v38, %v1301_v37  ;;  %v1942_v41 = vsub.f32 0.0, %v1805_v39  ;;  %v634_v39 = vpop.permute.xlu1 %633 }
 0x248   : > { %v1943_v42 = vsub.f32 0.0, %v1470_v40  ;;  %v3656_v43 = vpop.eup %3655  ;;  %v2165_v44 = vmul.f32 1.442695, %v1942_v41 }
 0x249   : > { %v3658_v45 = vpop.eup %3657  ;;  %v2324_v47 = vadd.f32 1.0, %v3656_v43  ;;  %v1638_v49 = vpop.f32.mrf.mxu2 }
 0x24a   : > { %v2167_v48 = vmul.f32 1.442695, %v1943_v42  ;;  %v3660_v50 = vpop.eup %3659  ;;  %2578 = vst [vmem:[%s4270_s11 + $0x2d8] sm:$0xff] %v3658_v45  ;;  %3663 = vpow2.f32 %v2165_v44  ;;  %v1639_v51 = vadd.f32 %v1638_v49, %v614_v27  ;;  %v1807_v52 = vpop.f32.mrf.mxu3 }
 0x24b   : > { %v1302_v53 = vpop.f32.mrf.mxu0  ;;  %v3662_v54 = vpop.eup %3661  ;;  %3665 = vrcp.f32 %v2324_v47  ;;  %v2325_v55 = vadd.f32 1.0, %v3660_v50 }
 0x24c   : > { %v1303_v56 = vadd.f32 %v1302_v53, %v619_v46  ;;  %v1471_v57 = vpop.f32.mrf.mxu1  ;;  %2579 = vst [vmem:[%s4270_s11 + $0x2e0] sm:$0xff] %v3662_v54  ;;  %3667 = vpow2.f32 %v2167_v48  ;;  %v1808_v58 = vadd.f32 %v1807_v52, %v1639_v51 }
 0x24d   : > { %3669 = vrcp.f32 %v2325_v55 }
 0x24e   : > { %v1472_v59 = vadd.f32 %v1471_v57, %v1303_v56  ;;  %v1944_v60 = vsub.f32 0.0, %v1808_v58  ;;  %v639_v58 = vpop.permute.xlu2 %638 }
 0x250   : > { %v1945_v61 = vsub.f32 0.0, %v1472_v59  ;;  %v3664_v62 = vpop.eup %3663  ;;  %v2169_v63 = vmul.f32 1.442695, %v1944_v60 }
 0x251   : > { %v3666_v0 = vpop.eup %3665  ;;  %v2326_v2 = vadd.f32 1.0, %v3664_v62  ;;  %v1640_v4 = vpop.f32.mrf.mxu2 }
 0x252   : > { %v2171_v3 = vmul.f32 1.442695, %v1945_v61  ;;  %v3668_v5 = vpop.eup %3667  ;;  %2580 = vst [vmem:[%s4270_s11 + $0x2e8] sm:$0xff] %v3666_v0  ;;  %3671 = vpow2.f32 %v2169_v63  ;;  %v1641_v6 = vadd.f32 %v1640_v4, %v619_v46  ;;  %v1809_v7 = vpop.f32.mrf.mxu3 }
 0x253   : > { %v1305_v8 = vpop.f32.mrf.mxu0  ;;  %v3670_v9 = vpop.eup %3669  ;;  %3673 = vrcp.f32 %v2326_v2  ;;  %v2327_v10 = vadd.f32 1.0, %v3668_v5 }
 0x254   : > { %v1306_v11 = vadd.f32 %v1305_v8, %v624_v1  ;;  %v1474_v12 = vpop.f32.mrf.mxu1  ;;  %2581 = vst [vmem:[%s4270_s11 + $0x2f0] sm:$0xff] %v3670_v9  ;;  %3675 = vpow2.f32 %v2171_v3  ;;  %v1810_v13 = vadd.f32 %v1809_v7, %v1641_v6 }
 0x255   : > { %3677 = vrcp.f32 %v2327_v10 }
 0x256   : > { %v1475_v14 = vadd.f32 %v1474_v12, %v1306_v11  ;;  %v1946_v15 = vsub.f32 0.0, %v1810_v13  ;;  %v644_v13 = vpop.permute.xlu0 %643 }
 0x258   : > { %v1947_v16 = vsub.f32 0.0, %v1475_v14  ;;  %v3672_v17 = vpop.eup %3671  ;;  %v2173_v18 = vmul.f32 1.442695, %v1946_v15 }
 0x259   : > { %v3674_v19 = vpop.eup %3673  ;;  %v2328_v21 = vadd.f32 1.0, %v3672_v17  ;;  %v1643_v23 = vpop.f32.mrf.mxu2 }
 0x25a   : > { %v2175_v22 = vmul.f32 1.442695, %v1947_v16  ;;  %v3676_v24 = vpop.eup %3675  ;;  %2582 = vst [vmem:[%s4270_s11 + $0x2f8] sm:$0xff] %v3674_v19  ;;  %3679 = vpow2.f32 %v2173_v18  ;;  %v1644_v25 = vadd.f32 %v1643_v23, %v624_v1  ;;  %v1812_v26 = vpop.f32.mrf.mxu3 }
 0x25b   : > { %v1307_v27 = vpop.f32.mrf.mxu0  ;;  %v3678_v28 = vpop.eup %3677  ;;  %3681 = vrcp.f32 %v2328_v21  ;;  %v2329_v29 = vadd.f32 1.0, %v3676_v24 }
 0x25c   : > { %v1308_v30 = vadd.f32 %v1307_v27, %v629_v20  ;;  %v1476_v31 = vpop.f32.mrf.mxu1  ;;  %2583 = vst [vmem:[%s4270_s11 + $0x300] sm:$0xff] %v3678_v28  ;;  %3683 = vpow2.f32 %v2175_v22  ;;  %v1813_v32 = vadd.f32 %v1812_v26, %v1644_v25 }
 0x25d   : > { %3685 = vrcp.f32 %v2329_v29 }
 0x25e   : > { %v1477_v33 = vadd.f32 %v1476_v31, %v1308_v30  ;;  %v1948_v34 = vsub.f32 0.0, %v1813_v32  ;;  %v649_v32 = vpop.permute.xlu1 %648 }
 0x260   : > { %v1949_v35 = vsub.f32 0.0, %v1477_v33  ;;  %v3680_v36 = vpop.eup %3679  ;;  %v2177_v37 = vmul.f32 1.442695, %v1948_v34 }
 0x261   : > { %v3682_v38 = vpop.eup %3681  ;;  %v2330_v40 = vadd.f32 1.0, %v3680_v36  ;;  %v1645_v42 = vpop.f32.mrf.mxu2 }
 0x262   : > { %v2179_v41 = vmul.f32 1.442695, %v1949_v35  ;;  %v3684_v43 = vpop.eup %3683  ;;  %2584 = vst [vmem:[%s4270_s11 + $0x308] sm:$0xff] %v3682_v38  ;;  %3687 = vpow2.f32 %v2177_v37  ;;  %v1646_v44 = vadd.f32 %v1645_v42, %v629_v20  ;;  %v1814_v45 = vpop.f32.mrf.mxu3 }
 0x263   : > { %v1310_v46 = vpop.f32.mrf.mxu0  ;;  %v3686_v47 = vpop.eup %3685  ;;  %3689 = vrcp.f32 %v2330_v40  ;;  %v2331_v48 = vadd.f32 1.0, %v3684_v43 }
 0x264   : > { %v1311_v49 = vadd.f32 %v1310_v46, %v634_v39  ;;  %v1479_v50 = vpop.f32.mrf.mxu1  ;;  %2585 = vst [vmem:[%s4270_s11 + $0x310] sm:$0xff] %v3686_v47  ;;  %3691 = vpow2.f32 %v2179_v41  ;;  %v1815_v51 = vadd.f32 %v1814_v45, %v1646_v44 }
 0x265   : > { %3693 = vrcp.f32 %v2331_v48 }
 0x266   : > { %v1480_v52 = vadd.f32 %v1479_v50, %v1311_v49  ;;  %v1950_v53 = vsub.f32 0.0, %v1815_v51  ;;  %v654_v51 = vpop.permute.xlu2 %653 }
 0x268   : > { %v1951_v54 = vsub.f32 0.0, %v1480_v52  ;;  %v3688_v55 = vpop.eup %3687  ;;  %v2181_v56 = vmul.f32 1.442695, %v1950_v53 }
 0x269   : > { %v3690_v57 = vpop.eup %3689  ;;  %v2332_v59 = vadd.f32 1.0, %v3688_v55  ;;  %v1648_v61 = vpop.f32.mrf.mxu2 }
 0x26a   : > { %v2183_v60 = vmul.f32 1.442695, %v1951_v54  ;;  %v3692_v62 = vpop.eup %3691  ;;  %2586 = vst [vmem:[%s4270_s11 + $0x318] sm:$0xff] %v3690_v57  ;;  %3695 = vpow2.f32 %v2181_v56  ;;  %v1649_v63 = vadd.f32 %v1648_v61, %v634_v39  ;;  %v1817_v0 = vpop.f32.mrf.mxu3 }
 0x26b   : > { %v1312_v1 = vpop.f32.mrf.mxu0  ;;  %v3694_v2 = vpop.eup %3693  ;;  %3697 = vrcp.f32 %v2332_v59  ;;  %v2333_v3 = vadd.f32 1.0, %v3692_v62 }
 0x26c   : > { %v1313_v4 = vadd.f32 %v1312_v1, %v639_v58  ;;  %v1481_v5 = vpop.f32.mrf.mxu1  ;;  %2587 = vst [vmem:[%s4270_s11 + $0x320] sm:$0xff] %v3694_v2  ;;  %3699 = vpow2.f32 %v2183_v60  ;;  %v1818_v6 = vadd.f32 %v1817_v0, %v1649_v63 }
 0x26d   : > { %3701 = vrcp.f32 %v2333_v3 }
 0x26e   : > { %v1482_v7 = vadd.f32 %v1481_v5, %v1313_v4  ;;  %v1952_v8 = vsub.f32 0.0, %v1818_v6  ;;  %v659_v6 = vpop.permute.xlu0 %658 }
 0x270   : > { %v1953_v9 = vsub.f32 0.0, %v1482_v7  ;;  %v3696_v10 = vpop.eup %3695  ;;  %v2185_v11 = vmul.f32 1.442695, %v1952_v8 }
 0x271   : > { %v3698_v12 = vpop.eup %3697  ;;  %v2334_v14 = vadd.f32 1.0, %v3696_v10  ;;  %v1650_v16 = vpop.f32.mrf.mxu2 }
 0x272   : > { %v2187_v15 = vmul.f32 1.442695, %v1953_v9  ;;  %v3700_v17 = vpop.eup %3699  ;;  %2588 = vst [vmem:[%s4270_s11 + $0x328] sm:$0xff] %v3698_v12  ;;  %3703 = vpow2.f32 %v2185_v11  ;;  %v1651_v18 = vadd.f32 %v1650_v16, %v639_v58  ;;  %v1819_v19 = vpop.f32.mrf.mxu3 }
 0x273   : > { %v1315_v20 = vpop.f32.mrf.mxu0  ;;  %v3702_v21 = vpop.eup %3701  ;;  %3705 = vrcp.f32 %v2334_v14  ;;  %v2335_v22 = vadd.f32 1.0, %v3700_v17 }
 0x274   : > { %v1316_v23 = vadd.f32 %v1315_v20, %v644_v13  ;;  %v1484_v24 = vpop.f32.mrf.mxu1  ;;  %2589 = vst [vmem:[%s4270_s11 + $0x330] sm:$0xff] %v3702_v21  ;;  %3707 = vpow2.f32 %v2187_v15  ;;  %v1820_v25 = vadd.f32 %v1819_v19, %v1651_v18 }
 0x275   : > { %3709 = vrcp.f32 %v2335_v22 }
 0x276   : > { %v1485_v26 = vadd.f32 %v1484_v24, %v1316_v23  ;;  %v1954_v27 = vsub.f32 0.0, %v1820_v25  ;;  %v664_v25 = vpop.permute.xlu1 %663 }
 0x278   : > { %v1955_v28 = vsub.f32 0.0, %v1485_v26  ;;  %v3704_v29 = vpop.eup %3703  ;;  %v2189_v30 = vmul.f32 1.442695, %v1954_v27 }
 0x279   : > { %v3706_v31 = vpop.eup %3705  ;;  %v2336_v33 = vadd.f32 1.0, %v3704_v29  ;;  %v1653_v35 = vpop.f32.mrf.mxu2 }
 0x27a   : > { %v2191_v34 = vmul.f32 1.442695, %v1955_v28  ;;  %v3708_v36 = vpop.eup %3707  ;;  %2590 = vst [vmem:[%s4270_s11 + $0x338] sm:$0xff] %v3706_v31  ;;  %3711 = vpow2.f32 %v2189_v30  ;;  %v1654_v37 = vadd.f32 %v1653_v35, %v644_v13  ;;  %v1822_v38 = vpop.f32.mrf.mxu3 }
 0x27b   : > { %v1317_v39 = vpop.f32.mrf.mxu0  ;;  %v3710_v40 = vpop.eup %3709  ;;  %3713 = vrcp.f32 %v2336_v33  ;;  %v2337_v41 = vadd.f32 1.0, %v3708_v36 }
 0x27c   : > { %v1318_v42 = vadd.f32 %v1317_v39, %v649_v32  ;;  %v1486_v43 = vpop.f32.mrf.mxu1  ;;  %2591 = vst [vmem:[%s4270_s11 + $0x340] sm:$0xff] %v3710_v40  ;;  %3715 = vpow2.f32 %v2191_v34  ;;  %v1823_v44 = vadd.f32 %v1822_v38, %v1654_v37 }
 0x27d   : > { %3717 = vrcp.f32 %v2337_v41 }
 0x27e   : > { %v1487_v45 = vadd.f32 %v1486_v43, %v1318_v42  ;;  %v1956_v46 = vsub.f32 0.0, %v1823_v44  ;;  %v669_v44 = vpop.permute.xlu2 %668 }
 0x280   : > { %v1957_v47 = vsub.f32 0.0, %v1487_v45  ;;  %v3712_v48 = vpop.eup %3711  ;;  %v2193_v49 = vmul.f32 1.442695, %v1956_v46 }
 0x281   : > { %v3714_v50 = vpop.eup %3713  ;;  %v2338_v52 = vadd.f32 1.0, %v3712_v48  ;;  %v1655_v54 = vpop.f32.mrf.mxu2 }
 0x282   : > { %v2195_v53 = vmul.f32 1.442695, %v1957_v47  ;;  %v3716_v55 = vpop.eup %3715  ;;  %2592 = vst [vmem:[%s4270_s11 + $0x348] sm:$0xff] %v3714_v50  ;;  %3719 = vpow2.f32 %v2193_v49  ;;  %v1656_v56 = vadd.f32 %v1655_v54, %v649_v32  ;;  %v1824_v57 = vpop.f32.mrf.mxu3 }
 0x283   : > { %v1320_v58 = vpop.f32.mrf.mxu0  ;;  %v3718_v59 = vpop.eup %3717  ;;  %3721 = vrcp.f32 %v2338_v52  ;;  %v2339_v60 = vadd.f32 1.0, %v3716_v55 }
 0x284   : > { %v1321_v61 = vadd.f32 %v1320_v58, %v654_v51  ;;  %v1489_v62 = vpop.f32.mrf.mxu1  ;;  %2593 = vst [vmem:[%s4270_s11 + $0x350] sm:$0xff] %v3718_v59  ;;  %3723 = vpow2.f32 %v2195_v53  ;;  %v1825_v63 = vadd.f32 %v1824_v57, %v1656_v56 }
 0x285   : > { %3725 = vrcp.f32 %v2339_v60 }
 0x286   : > { %v1490_v0 = vadd.f32 %v1489_v62, %v1321_v61  ;;  %v1958_v1 = vsub.f32 0.0, %v1825_v63  ;;  %v674_v63 = vpop.permute.xlu0 %673 }
 0x288   : > { %v1959_v2 = vsub.f32 0.0, %v1490_v0  ;;  %v3720_v3 = vpop.eup %3719  ;;  %v2197_v4 = vmul.f32 1.442695, %v1958_v1 }
 0x289   : > { %v3722_v5 = vpop.eup %3721  ;;  %v2340_v7 = vadd.f32 1.0, %v3720_v3  ;;  %v1658_v9 = vpop.f32.mrf.mxu2 }
 0x28a   : > { %v2199_v8 = vmul.f32 1.442695, %v1959_v2  ;;  %v3724_v10 = vpop.eup %3723  ;;  %2594 = vst [vmem:[%s4270_s11 + $0x358] sm:$0xff] %v3722_v5  ;;  %3727 = vpow2.f32 %v2197_v4  ;;  %v1659_v11 = vadd.f32 %v1658_v9, %v654_v51  ;;  %v1827_v12 = vpop.f32.mrf.mxu3 }
 0x28b   : > { %v1322_v13 = vpop.f32.mrf.mxu0  ;;  %v3726_v14 = vpop.eup %3725  ;;  %3729 = vrcp.f32 %v2340_v7  ;;  %v2341_v15 = vadd.f32 1.0, %v3724_v10 }
 0x28c   : > { %v1323_v16 = vadd.f32 %v1322_v13, %v659_v6  ;;  %v1491_v17 = vpop.f32.mrf.mxu1  ;;  %2595 = vst [vmem:[%s4270_s11 + $0x360] sm:$0xff] %v3726_v14  ;;  %3731 = vpow2.f32 %v2199_v8  ;;  %v1828_v18 = vadd.f32 %v1827_v12, %v1659_v11 }
 0x28d   : > { %3733 = vrcp.f32 %v2341_v15 }
 0x28e   : > { %v1492_v19 = vadd.f32 %v1491_v17, %v1323_v16  ;;  %v1960_v20 = vsub.f32 0.0, %v1828_v18  ;;  %v679_v18 = vpop.permute.xlu1 %678 }
 0x290   : > { %v1961_v21 = vsub.f32 0.0, %v1492_v19  ;;  %v3728_v22 = vpop.eup %3727  ;;  %v2201_v23 = vmul.f32 1.442695, %v1960_v20 }
 0x291   : > { %v3730_v24 = vpop.eup %3729  ;;  %v2342_v26 = vadd.f32 1.0, %v3728_v22  ;;  %v1660_v28 = vpop.f32.mrf.mxu2 }
 0x292   : > { %v2203_v27 = vmul.f32 1.442695, %v1961_v21  ;;  %v3732_v29 = vpop.eup %3731  ;;  %2596 = vst [vmem:[%s4270_s11 + $0x368] sm:$0xff] %v3730_v24  ;;  %3735 = vpow2.f32 %v2201_v23  ;;  %v1661_v30 = vadd.f32 %v1660_v28, %v659_v6  ;;  %v1829_v31 = vpop.f32.mrf.mxu3 }
 0x293   : > { %v1325_v32 = vpop.f32.mrf.mxu0  ;;  %v3734_v33 = vpop.eup %3733  ;;  %3737 = vrcp.f32 %v2342_v26  ;;  %v2343_v34 = vadd.f32 1.0, %v3732_v29 }
 0x294   : > { %v1326_v35 = vadd.f32 %v1325_v32, %v664_v25  ;;  %v1494_v36 = vpop.f32.mrf.mxu1  ;;  %2597 = vst [vmem:[%s4270_s11 + $0x370] sm:$0xff] %v3734_v33  ;;  %3739 = vpow2.f32 %v2203_v27  ;;  %v1830_v37 = vadd.f32 %v1829_v31, %v1661_v30 }
 0x295   : > { %3741 = vrcp.f32 %v2343_v34 }
 0x296   : > { %v1495_v38 = vadd.f32 %v1494_v36, %v1326_v35  ;;  %v1962_v39 = vsub.f32 0.0, %v1830_v37  ;;  %v684_v37 = vpop.permute.xlu2 %683 }
 0x298   : > { %v1963_v40 = vsub.f32 0.0, %v1495_v38  ;;  %v3736_v41 = vpop.eup %3735  ;;  %v2205_v42 = vmul.f32 1.442695, %v1962_v39 }
 0x299   : > { %v3738_v43 = vpop.eup %3737  ;;  %v2344_v45 = vadd.f32 1.0, %v3736_v41  ;;  %v1663_v47 = vpop.f32.mrf.mxu2 }
 0x29a   : > { %v2207_v46 = vmul.f32 1.442695, %v1963_v40  ;;  %v3740_v48 = vpop.eup %3739  ;;  %2598 = vst [vmem:[%s4270_s11 + $0x378] sm:$0xff] %v3738_v43  ;;  %3743 = vpow2.f32 %v2205_v42  ;;  %v1664_v49 = vadd.f32 %v1663_v47, %v664_v25  ;;  %v1832_v50 = vpop.f32.mrf.mxu3 }
 0x29b   : > { %v1327_v51 = vpop.f32.mrf.mxu0  ;;  %v3742_v52 = vpop.eup %3741  ;;  %3745 = vrcp.f32 %v2344_v45  ;;  %v2345_v53 = vadd.f32 1.0, %v3740_v48 }
 0x29c   : > { %v1328_v54 = vadd.f32 %v1327_v51, %v669_v44  ;;  %v1496_v55 = vpop.f32.mrf.mxu1  ;;  %2599 = vst [vmem:[%s4270_s11 + $0x380] sm:$0xff] %v3742_v52  ;;  %3747 = vpow2.f32 %v2207_v46  ;;  %v1833_v56 = vadd.f32 %v1832_v50, %v1664_v49 }
 0x29d   : > { %3749 = vrcp.f32 %v2345_v53 }
 0x29e   : > { %v1497_v57 = vadd.f32 %v1496_v55, %v1328_v54  ;;  %v1964_v58 = vsub.f32 0.0, %v1833_v56  ;;  %v689_v56 = vpop.permute.xlu0 %688 }
 0x2a0   : > { %v1965_v59 = vsub.f32 0.0, %v1497_v57  ;;  %v3744_v60 = vpop.eup %3743  ;;  %v2209_v61 = vmul.f32 1.442695, %v1964_v58 }
 0x2a1   : > { %v3746_v62 = vpop.eup %3745  ;;  %v2346_v0 = vadd.f32 1.0, %v3744_v60  ;;  %v1665_v2 = vpop.f32.mrf.mxu2 }
 0x2a2   : > { %v2211_v1 = vmul.f32 1.442695, %v1965_v59  ;;  %v3748_v3 = vpop.eup %3747  ;;  %2600 = vst [vmem:[%s4270_s11 + $0x388] sm:$0xff] %v3746_v62  ;;  %3751 = vpow2.f32 %v2209_v61  ;;  %v1666_v4 = vadd.f32 %v1665_v2, %v669_v44  ;;  %v1834_v5 = vpop.f32.mrf.mxu3 }
 0x2a3   : > { %v1330_v6 = vpop.f32.mrf.mxu0  ;;  %v3750_v7 = vpop.eup %3749  ;;  %3753 = vrcp.f32 %v2346_v0  ;;  %v2347_v8 = vadd.f32 1.0, %v3748_v3 }
 0x2a4   : > { %v1331_v9 = vadd.f32 %v1330_v6, %v674_v63  ;;  %v1499_v10 = vpop.f32.mrf.mxu1  ;;  %2601 = vst [vmem:[%s4270_s11 + $0x390] sm:$0xff] %v3750_v7  ;;  %3755 = vpow2.f32 %v2211_v1  ;;  %v1835_v11 = vadd.f32 %v1834_v5, %v1666_v4 }
 0x2a5   : > { %3757 = vrcp.f32 %v2347_v8 }
 0x2a6   : > { %v1500_v12 = vadd.f32 %v1499_v10, %v1331_v9  ;;  %v1966_v13 = vsub.f32 0.0, %v1835_v11 }
 0x2a8   : > { %v1967_v14 = vsub.f32 0.0, %v1500_v12  ;;  %v3752_v15 = vpop.eup %3751  ;;  %v2213_v16 = vmul.f32 1.442695, %v1966_v13 }
 0x2a9   : > { %v3754_v17 = vpop.eup %3753  ;;  %v2348_v19 = vadd.f32 1.0, %v3752_v15  ;;  %v1668_v21 = vpop.f32.mrf.mxu2 }
 0x2aa   : > { %v2215_v20 = vmul.f32 1.442695, %v1967_v14  ;;  %v3756_v22 = vpop.eup %3755  ;;  %2602 = vst [vmem:[%s4270_s11 + $0x398] sm:$0xff] %v3754_v17  ;;  %3759 = vpow2.f32 %v2213_v16  ;;  %v1669_v23 = vadd.f32 %v1668_v21, %v674_v63  ;;  %v1837_v24 = vpop.f32.mrf.mxu3 }
 0x2ab   : > { %v1332_v25 = vpop.f32.mrf.mxu0  ;;  %v3758_v26 = vpop.eup %3757  ;;  %3761 = vrcp.f32 %v2348_v19  ;;  %v2349_v27 = vadd.f32 1.0, %v3756_v22 }
 0x2ac   : > { %v1333_v28 = vadd.f32 %v1332_v25, %v679_v18  ;;  %v1501_v29 = vpop.f32.mrf.mxu1  ;;  %2603 = vst [vmem:[%s4270_s11 + $0x3a0] sm:$0xff] %v3758_v26  ;;  %3763 = vpow2.f32 %v2215_v20  ;;  %v1838_v30 = vadd.f32 %v1837_v24, %v1669_v23 }
 0x2ad   : > { %3765 = vrcp.f32 %v2349_v27 }
 0x2ae   : > { %v1502_v31 = vadd.f32 %v1501_v29, %v1333_v28  ;;  %v1968_v32 = vsub.f32 0.0, %v1838_v30 }
 0x2b0   : > { %v1969_v33 = vsub.f32 0.0, %v1502_v31  ;;  %v3760_v34 = vpop.eup %3759  ;;  %v2217_v35 = vmul.f32 1.442695, %v1968_v32 }
 0x2b1   : > { %v3762_v36 = vpop.eup %3761  ;;  %v2350_v38 = vadd.f32 1.0, %v3760_v34  ;;  %v1670_v40 = vpop.f32.mrf.mxu2 }
 0x2b2   : > { %v2219_v39 = vmul.f32 1.442695, %v1969_v33  ;;  %v3764_v41 = vpop.eup %3763  ;;  %2604 = vst [vmem:[%s4270_s11 + $0x3a8] sm:$0xff] %v3762_v36  ;;  %3767 = vpow2.f32 %v2217_v35  ;;  %v1671_v42 = vadd.f32 %v1670_v40, %v679_v18  ;;  %v1839_v43 = vpop.f32.mrf.mxu3 }
 0x2b3   : > { %v1335_v44 = vpop.f32.mrf.mxu0  ;;  %v3766_v45 = vpop.eup %3765  ;;  %3769 = vrcp.f32 %v2350_v38  ;;  %v2351_v46 = vadd.f32 1.0, %v3764_v41 }
 0x2b4   : > { %v1336_v47 = vadd.f32 %v1335_v44, %v684_v37  ;;  %v1504_v48 = vpop.f32.mrf.mxu1  ;;  %2605 = vst [vmem:[%s4270_s11 + $0x3b0] sm:$0xff] %v3766_v45  ;;  %3771 = vpow2.f32 %v2219_v39  ;;  %v1840_v49 = vadd.f32 %v1839_v43, %v1671_v42 }
 0x2b5   : > { %3773 = vrcp.f32 %v2351_v46 }
 0x2b6   : > { %v1505_v50 = vadd.f32 %v1504_v48, %v1336_v47  ;;  %v1970_v51 = vsub.f32 0.0, %v1840_v49 }
 0x2b8   : > { %v1971_v52 = vsub.f32 0.0, %v1505_v50  ;;  %v3768_v53 = vpop.eup %3767  ;;  %v2221_v54 = vmul.f32 1.442695, %v1970_v51 }
 0x2b9   : > { %v3770_v55 = vpop.eup %3769  ;;  %v2352_v57 = vadd.f32 1.0, %v3768_v53  ;;  %v1673_v59 = vpop.f32.mrf.mxu2 }
 0x2ba   : > { %v2223_v58 = vmul.f32 1.442695, %v1971_v52  ;;  %v3772_v60 = vpop.eup %3771  ;;  %2606 = vst [vmem:[%s4270_s11 + $0x3b8] sm:$0xff] %v3770_v55  ;;  %3775 = vpow2.f32 %v2221_v54  ;;  %v1674_v61 = vadd.f32 %v1673_v59, %v684_v37  ;;  %v1842_v62 = vpop.f32.mrf.mxu3 }
 0x2bb   : > { %v1337_v63 = vpop.f32.mrf.mxu0  ;;  %v3774_v0 = vpop.eup %3773  ;;  %3777 = vrcp.f32 %v2352_v57  ;;  %v2353_v1 = vadd.f32 1.0, %v3772_v60 }
 0x2bc   : > { %v1338_v2 = vadd.f32 %v1337_v63, %v689_v56  ;;  %2607 = vst [vmem:[%s4270_s11 + $0x3c0] sm:$0xff] %v3774_v0  ;;  %3779 = vpow2.f32 %v2223_v58  ;;  %v1843_v3 = vadd.f32 %v1842_v62, %v1674_v61  ;;  %v1506_v4 = vpop.f32.mrf.mxu1 }
 0x2bd   : > { %3781 = vrcp.f32 %v2353_v1 }
 0x2be   : > { %v1507_v5 = vadd.f32 %v1506_v4, %v1338_v2  ;;  %v1972_v6 = vsub.f32 0.0, %v1843_v3 }
 0x2c0   : > { %v1973_v7 = vsub.f32 0.0, %v1507_v5  ;;  %v3776_v8 = vpop.eup %3775  ;;  %v2225_v9 = vmul.f32 1.442695, %v1972_v6 }
 0x2c1   : > { %v3778_v10 = vpop.eup %3777  ;;  %v2354_v11 = vadd.f32 1.0, %v3776_v8  ;;  %v1675_v13 = vpop.f32.mrf.mxu2 }
 0x2c2   : > { %v2227_v12 = vmul.f32 1.442695, %v1973_v7  ;;  %v3780_v14 = vpop.eup %3779  ;;  %2608 = vst [vmem:[%s4270_s11 + $0x3c8] sm:$0xff] %v3778_v10  ;;  %3783 = vpow2.f32 %v2225_v9  ;;  %v1676_v15 = vadd.f32 %v1675_v13, %v689_v56  ;;  %v1844_v18 = vpop.f32.mrf.mxu3 }
 0x2c3   : > { %v3782_v16 = vpop.eup %3781  ;;  %3785 = vrcp.f32 %v2354_v11  ;;  %v2355_v17 = vadd.f32 1.0, %v3780_v14 }
 0x2c4   : > { %2609 = vst [vmem:[%s4270_s11 + $0x3d0] sm:$0xff] %v3782_v16  ;;  %3787 = vpow2.f32 %v2227_v12  ;;  %v1845_v19 = vadd.f32 %v1844_v18, %v1676_v15 }
 0x2c5   : > { %3789 = vrcp.f32 %v2355_v17 }
 0x2c6   : > { %v1974_v20 = vsub.f32 0.0, %v1845_v19 }
 0x2c8   : > { %v3784_v21 = vpop.eup %3783  ;;  %v2229_v22 = vmul.f32 1.442695, %v1974_v20 }
 0x2c9   : > { %v3786_v23 = vpop.eup %3785  ;;  %v2356_v24 = vadd.f32 1.0, %v3784_v21 }
 0x2ca   : > { %v3788_v25 = vpop.eup %3787  ;;  %2610 = vst [vmem:[%s4270_s11 + $0x3d8] sm:$0xff] %v3786_v23  ;;  %3791 = vpow2.f32 %v2229_v22 }
 0x2cb   : > { %v3790_v26 = vpop.eup %3789  ;;  %3793 = vrcp.f32 %v2356_v24  ;;  %v2357_v27 = vadd.f32 1.0, %v3788_v25 }
 0x2cc   : > { %2611 = vst [vmem:[%s4270_s11 + $0x3e0] sm:$0xff] %v3790_v26 }
 0x2cd   : > { %3795 = vrcp.f32 %v2357_v27 }
 0x2d0   : > { %v3792_v28 = vpop.eup %3791 }
 0x2d1   : > { %v3794_v29 = vpop.eup %3793  ;;  %v2358_v30 = vadd.f32 1.0, %v3792_v28 }
 0x2d2   : > { %2612 = vst [vmem:[%s4270_s11 + $0x3e8] sm:$0xff] %v3794_v29 }
 0x2d3   : > { %v3796_v31 = vpop.eup %3795  ;;  %3797 = vrcp.f32 %v2358_v30 }
 0x2d4   : > { %2613 = vst [vmem:[%s4270_s11 + $0x3f0] sm:$0xff] %v3796_v31 }
 0x2d9   : > { %v3798_v32 = vpop.eup %3797 }
 0x2da   : > { %2614 = vst [vmem:[%s4270_s11 + $0x3f8] sm:$0xff] %v3798_v32 }
 0x2db   : > { %3856 = shalt.err (!%p3853_p13)
}
 0x2dc   : > { %s3916_s19 = smov 256   ;;  %s3917_s11 = smov 16  }
 0x2dd   : > { %3219 = dma.vmem_to_hbm [thread:$0]  (%p3989_p9), %s2631_s7, 16384, %s2633_s8, %s2616_s9, %s3916_s19, %s3916_s19, %s3917_s11  }
 0x2de PF: > { %s2647_s24 = sand.u32 1, %s3891_s12   ;;  %p3226_p0 = pnand %p2723_p12, %p3996_p11 }
 0x2df   : > { %s2648_s28 = scalar_lea.sflag [#allocation4], %s2647_s24 }
 0x2e0   : > { %p3227_p1 = pneg %p3226_p0 }
 0x2e2   : > { %3886 = dma.done.wait (%p3227_p1), %s2648_s28, 16384  }
 0x2e3   : > { %3888 = vsyncadd (%p3227_p1), %s2648_s28, 4294950912  ;;  %s19_s17 = sadd.s32 1, %s3911_s17   ;;  %s4840_s12 = smov %s3895_s13 }
 0x2e4   : > { %p16_p2 = scmp.ge.s32.totalorder %s19_s17, 4   ;;  %s4841_s13 = smov %s3899_s14 }
 0x2e5   : > { %s4842_s14 = smov %s3994_s26  ;;  %s4843_s15 = smov %s3907_s16 }
 0x2e6   : > { %s4844_s16 = smov %s4846_s20  ;;  %18 = sbr.rel (!%p16_p2) target bundleno = 6 (0x6), region = 77 }
 0x2eb   :  { %2654 = vsyncpa [#allocation3], 1 }
 0x2ec   :  { %2656 = vsyncpa [#allocation3 + $0x1], 1 }
 0x2ed   :  { %2657 = vsyncpa [#allocation4], 1 }
 0x2ee   :  { %2659 = vsyncpa [#allocation4 + $0x1], 1 }

</bundles_post_ra>
